<compile_context>
chip_gen: v7x
topology: tpu7x:2x2x1
jax: 0.10.0
libtpu: 0.0.40
codegen_flags: <defaults>
</compile_context>

<pallas_src>
import functools

import jax
import jax.numpy as jnp
from jax.experimental import pallas as pl
from jax.experimental.pallas import tpu as pltpu

NEG_SLOPE = 0.01  # torch.nn.functional.leaky_relu default


def _leaky_relu(v):
    # max(v, a*v) == leaky_relu for 0 < a < 1; cheaper than where(cmp, ., .)
    return jnp.maximum(v, NEG_SLOPE * v)


def _epic_disc_kernel(
    x_ref, mask_ref, cond_ref,
    l1w_ref, l1b_ref, l2w_ref, l2b_ref,
    g1wp_ref, g1wc_ref, g1b_ref, g2w_ref, g2b_ref,
    eg1wpg_ref, eg1wc_ref, eg1b_ref, eg2w_ref, eg2b_ref,
    el1wl_ref, el1wg_ref, el1b_ref, el2w_ref, el2b_ref,
    g3wpg_ref, g3wc_ref, g3b_ref, g4w_ref, g4b_ref,
    g5wt_ref, g5b_ref,
    out_ref,
    *, mxu_dtype):

    TB, N, F = x_ref.shape
    H = l1b_ref.shape[-1]
    n_layers = eg1wpg_ref.shape[0]
    TBN = TB * N

    def dot(a, w):
        # MXU weights are pre-cast to mxu_dtype in the wrapper; only the activation is cast.
        return jnp.dot(a.astype(mxu_dtype), w, preferred_element_type=jnp.float32)

    def cond_term(c, w):
        # (TB, C) @ (C, H); for C == 1 it's a VPU outer product (no degenerate K=1 MXU push).
        if c.shape[1] == 1:
            return c * w
        return jnp.dot(c.astype(mxu_dtype), w.astype(mxu_dtype),
                       preferred_element_type=jnp.float32)

    x = x_ref[...].reshape(TBN, F)     # N % 8 == 0 guaranteed -> layout no-op
    cond = cond_ref[...]               # (TB, C)
    mask = mask_ref[...]               # (TB, N, 1); lane-splat happens inside the multiply

    # ---------------- local encoder (all points of all TB events in one matmul) ---------
    xl = _leaky_relu(dot(x, l1w_ref[...]) + l1b_ref[...])                  # (TBN, H)
    xl = _leaky_relu(dot(xl, l2w_ref[...]) + l2b_ref[...] + xl)

    def pool_sum(xl_flat):
        # raw masked sum over points; 1/N (torch .mean(1)) and sum_scale are pre-folded
        # into the pooled-path weight slices in the wrapper, so one matmul suffices.
        return jnp.sum(xl_flat.reshape(TB, N, H) * mask, axis=1)           # (TB, H)

    # ---------------- global encoder ----------------------------------------------------
    s = pool_sum(xl)
    xg = _leaky_relu(dot(s, g1wp_ref[...]) + cond_term(cond, g1wc_ref[...]) + g1b_ref[...])
    xg = _leaky_relu(dot(xg, g2w_ref[...]) + g2b_ref[...])                 # (TB, Z)

    # ---------------- EPiC equivariant layers (n_layers is small: static unroll) --------
    for l in range(n_layers):
        s = pool_sum(xl)
        sg = jnp.concatenate([s, xg], axis=-1)                             # (TB, H+Z)
        h1 = _leaky_relu(dot(sg, eg1wpg_ref[l])
                         + cond_term(cond, eg1wc_ref[l]) + eg1b_ref[l])    # (TB, H)
        xg = _leaky_relu(dot(h1, eg2w_ref[l]) + eg2b_ref[l] + xg)          # (TB, Z)

        g_loc = dot(xg, el1wg_ref[l])                                      # (TB, H)
        loc1 = dot(xl, el1wl_ref[l]).reshape(TB, N, H)
        loc1 = _leaky_relu(loc1 + g_loc[:, None, :] + el1b_ref[l])         # implicit broadcast
        loc1 = loc1.reshape(TBN, H)
        xl = _leaky_relu(dot(loc1, el2w_ref[l]) + el2b_ref[l] + xl)

    # ---------------- output head -------------------------------------------------------
    s = pool_sum(xl)
    sg = jnp.concatenate([s, xg], axis=-1)
    y = _leaky_relu(dot(sg, g3wpg_ref[...]) + cond_term(cond, g3wc_ref[...]) + g3b_ref[...])
    y = _leaky_relu(dot(y, g4w_ref[...]) + g4b_ref[...] + y)
    # final H -> 1 projection: multiply + lane reduce instead of a degenerate MXU push.
    out_ref[...] = jnp.sum(y * g5wt_ref[...], axis=-1, keepdims=True) + g5b_ref[...]


def epic_discriminator_forward(x, cond, mask, params, *, sum_scale,
                               tb=128, mxu_dtype=jnp.bfloat16):
    B, N, F = x.shape
    H = params["l1w"].shape[1]
    Z = params["g2w"].shape[1]
    C = cond.shape[1]
    n_layers = int(params["eg1w"].shape[0])

    x = x.astype(jnp.float32)
    mask = mask.astype(jnp.float32)
    cond = cond.astype(jnp.float32)

    # ---- pad points to a multiple of 8 (mask=0) so in-kernel reshapes are layout no-ops --
    N_pad = ((N + 7) // 8) * 8
    if N_pad != N:
        x = jnp.pad(x, ((0, 0), (0, N_pad - N), (0, 0)))
        mask = jnp.pad(mask, ((0, 0), (0, N_pad - N), (0, 0)))

    # ---- pre-split / fold concatenated-linear weights; pre-cast MXU operands -------------
    p = {k: jnp.asarray(v, jnp.float32) for k, v in params.items()}
    inv_n = jnp.float32(1.0 / N)          # torch .mean(1) divides by the ORIGINAL n_points
    ss = jnp.float32(sum_scale)
    g1w, g3w, eg1w, el1w = p["g1w"], p["g3w"], p["eg1w"], p["el1w"]

    def mx(w):                            # MXU-operand weights: cast once in the wrapper
        return w.astype(mxu_dtype)

    g1wp = g1w[:H] * inv_n + g1w[H:2 * H] * ss                               # (H, H)
    eg1wpg = jnp.concatenate(                                                # (L, H+Z, H)
        [eg1w[:, :H] * inv_n + eg1w[:, H:2 * H] * ss, eg1w[:, 2 * H:2 * H + Z]], axis=1)
    g3wpg = jnp.concatenate(                                                 # (H+Z, H)
        [g3w[:H] * inv_n + g3w[H:2 * H] * ss, g3w[2 * H:2 * H + Z]], axis=0)

    weights = [
        mx(p["l1w"]), p["l1b"], mx(p["l2w"]), p["l2b"],
        mx(g1wp), g1w[2 * H:], p["g1b"], mx(p["g2w"]), p["g2b"],
        mx(eg1wpg), eg1w[:, 2 * H + Z:], p["eg1b"], mx(p["eg2w"]), p["eg2b"],
        mx(el1w[:, :H]), mx(el1w[:, H:]), p["el1b"], mx(p["el2w"]), p["el2b"],
        mx(g3wpg), g3w[2 * H + Z:], p["g3b"], mx(p["g4w"]), p["g4b"],
        p["g5w"].T, p["g5b"],
    ]
    weight_bytes = sum(int(w.size) * int(w.dtype.itemsize) for w in weights)

    # ---- batch tile: multiple of 8, >=2 grid steps when B allows (v7x 2 TCs), VMEM budget -
    b8 = ((B + 7) // 8) * 8
    tb = max(8, (int(tb) // 8) * 8)
    if b8 >= 16:
        tb = min(tb, max(8, (b8 // 2) // 8 * 8))
    tb = min(tb, b8)

    def vmem_estimate(t):
        inputs = 2 * (t * N_pad * F + t * N_pad + t * C) * 4     # double-buffered input tiles
        acts = 6 * t * N_pad * H * 4                              # xl, loc1 + matmul transients
        return inputs + acts + weight_bytes + (2 << 20)           # headroom

    VMEM_BUDGET = 48 << 20            # safe under v7x's 64 MiB physical; plenty on v5e/v6e
    while tb > 8 and vmem_estimate(tb) > VMEM_BUDGET:
        tb = max(8, (tb // 2) // 8 * 8)
    vmem_limit = int(min(60 << 20, max(32 << 20, int(vmem_estimate(tb) * 1.25))))

    B_pad = ((B + tb - 1) // tb) * tb
    pad = B_pad - B
    if pad > 0:                        # avoid an HBM round-trip copy when tb divides B
        x = jnp.pad(x, ((0, pad), (0, 0), (0, 0)))
        mask = jnp.pad(mask, ((0, pad), (0, 0), (0, 0)))
        cond = jnp.pad(cond, ((0, pad), (0, 0)))

    # ---- advisory cost estimate -----------------------------------------------------------
    per_event_flops = (
        2 * N_pad * F * H + 2 * N_pad * H * H                     # local encoder
        + 2 * H * H + 2 * C * H + 2 * H * Z                       # global encoder
        + n_layers * (2 * (H + Z) * H + 2 * C * H                 # eg1 (fused)
                      + 2 * H * Z                                 # eg2
                      + 2 * Z * H + 2 * N_pad * H * H             # el1
                      + 2 * N_pad * H * H)                        # el2
        + 2 * (H + Z) * H + 2 * C * H                             # g3 (fused)
        + 2 * H * H + 2 * H                                       # g4, g5
    )
    cost = pl.CostEstimate(
        flops=int(B_pad) * int(per_event_flops),
        transcendentals=0,
        bytes_accessed=int(x.size + mask.size + cond.size + B_pad) * 4 + weight_bytes,
    )

    kernel = functools.partial(_epic_disc_kernel, mxu_dtype=mxu_dtype)

    in_specs = [
        pl.BlockSpec((tb, N_pad, F), lambda b: (b, 0, 0)),
        pl.BlockSpec((tb, N_pad, 1), lambda b: (b, 0, 0)),
        pl.BlockSpec((tb, C), lambda b: (b, 0)),
    ] + [
        pl.BlockSpec(w.shape, lambda b, nd=w.ndim: (0,) * nd) for w in weights
    ]

    out = pl.pallas_call(
        kernel,
        grid=(B_pad // tb,),
        in_specs=in_specs,
        out_specs=pl.BlockSpec((tb, 1), lambda b: (b, 0)),
        out_shape=jax.ShapeDtypeStruct((B_pad, 1), jnp.float32),
        compiler_params=pltpu.CompilerParams(
            dimension_semantics=("parallel",),     # batch tiles independent -> both TCs on v7x
            vmem_limit_bytes=vmem_limit),
        cost_estimate=cost,
    )(x, mask, cond, *weights)
    return out[:B]


# ----------------------------- pure-JAX reference -----------------------------
def reference_forward(x, cond, mask, p, *, sum_scale, n_layers):
    lrelu = _leaky_relu
    N = x.shape[1]

    xl = lrelu(x @ p["l1w"] + p["l1b"])
    xl = lrelu(xl @ p["l2w"] + p["l2b"] + xl)

    def pool(xl):
        s = jnp.sum(xl * mask, axis=1)
        return s / N, s * sum_scale

    m, s = pool(xl)
    xg = lrelu(jnp.concatenate([m, s, cond], axis=1) @ p["g1w"] + p["g1b"])
    xg = lrelu(xg @ p["g2w"] + p["g2b"])

    for l in range(n_layers):
        m, s = pool(xl)
        inp = jnp.concatenate([m, s, xg, cond], axis=1)
        g1 = lrelu(inp @ p["eg1w"][l] + p["eg1b"][l])
        xg = lrelu(g1 @ p["eg2w"][l] + p["eg2b"][l] + xg)
        gl = jnp.broadcast_to(xg[:, None, :], (x.shape[0], N, xg.shape[-1]))
        li = jnp.concatenate([xl, gl], axis=2)
        l1 = lrelu(li @ p["el1w"][l] + p["el1b"][l])
        xl = lrelu(l1 @ p["el2w"][l] + p["el2b"][l] + xl)

    m, s = pool(xl)
    y = jnp.concatenate([m, s, xg, cond], axis=1)
    y = lrelu(y @ p["g3w"] + p["g3b"])
    y = lrelu(y @ p["g4w"] + p["g4b"] + y)
    return y @ p["g5w"] + p["g5b"]


# ----------------------------- deterministic init -----------------------------
def init_params(key, *, feats, hid, latent, cond_feats, n_layers):
    def lin(k, din, dout):
        kw, kb = jax.random.split(k)
        bound = 1.0 / jnp.sqrt(din)
        w = jax.random.uniform(kw, (din, dout), jnp.float32, -bound, bound)
        b = jax.random.uniform(kb, (1, dout), jnp.float32, -bound, bound)
        return w, b

    keys = jax.random.split(key, 7 + 4 * n_layers)
    p = {}
    p["l1w"], p["l1b"] = lin(keys[0], feats, hid)
    p["l2w"], p["l2b"] = lin(keys[1], hid, hid)
    p["g1w"], p["g1b"] = lin(keys[2], 2 * hid + cond_feats, hid)
    p["g2w"], p["g2b"] = lin(keys[3], hid, latent)

    eg1w, eg1b, eg2w, eg2b, el1w, el1b, el2w, el2b = ([] for _ in range(8))
    for l in range(n_layers):
        k0, k1, k2, k3 = jax.random.split(keys[4 + l], 4)
        w, b = lin(k0, 2 * hid + latent + cond_feats, hid); eg1w.append(w); eg1b.append(b)
        w, b = lin(k1, hid, latent);                        eg2w.append(w); eg2b.append(b)
        w, b = lin(k2, hid + latent, hid);                  el1w.append(w); el1b.append(b)
        w, b = lin(k3, hid, hid);                           el2w.append(w); el2b.append(b)
    p["eg1w"], p["eg1b"] = jnp.stack(eg1w), jnp.stack(eg1b)
    p["eg2w"], p["eg2b"] = jnp.stack(eg2w), jnp.stack(eg2b)
    p["el1w"], p["el1b"] = jnp.stack(el1w), jnp.stack(el1b)
    p["el2w"], p["el2b"] = jnp.stack(el2w), jnp.stack(el2b)

    p["g3w"], p["g3b"] = lin(keys[4 + n_layers], 2 * hid + latent + cond_feats, hid)
    p["g4w"], p["g4b"] = lin(keys[5 + n_layers], hid, hid)
    p["g5w"], p["g5b"] = lin(keys[6 + n_layers], hid, 1)
    return p


if __name__ == "__main__":
    args = dict(hid_d=32, feats=4, equiv_layers_discriminator=2,
                latent=16, cond_feats=1, sum_scale=0.01)
    B, N = 2, 8

    key = jax.random.PRNGKey(0)
    kx, kc, km, kp = jax.random.split(key, 4)
    x = jax.random.normal(kx, (B, N, args["feats"]), jnp.float32)
    cond = jax.random.normal(kc, (B, args["cond_feats"]), jnp.float32)
    mask = (jax.random.uniform(km, (B, N, 1)) > 0.3).astype(jnp.float32)

    params = init_params(kp, feats=args["feats"], hid=args["hid_d"],
                         latent=args["latent"], cond_feats=args["cond_feats"],
                         n_layers=args["equiv_layers_discriminator"])

    # Throughput path: bf16 MXU operands (default), f32 accumulation.
    out_bf16 = epic_discriminator_forward(
        x, cond, mask, params, sum_scale=args["sum_scale"], tb=128)
    # Exactness path: f32 MXU operands.
    out_f32 = epic_discriminator_forward(
        x, cond, mask, params, sum_scale=args["sum_scale"], tb=128,
        mxu_dtype=jnp.float32)
    out_bf16, out_f32 = jax.block_until_ready((out_bf16, out_f32))

    ref = reference_forward(x, cond, mask, params,
                            sum_scale=args["sum_scale"],
                            n_layers=args["equiv_layers_discriminator"])

    assert out_f32.shape == (B, 1), out_f32.shape
    assert out_bf16.shape == (B, 1), out_bf16.shape
    assert jnp.allclose(out_f32, ref, atol=5e-3, rtol=5e-3), (out_f32, ref)
    assert jnp.allclose(out_bf16, ref, atol=5e-2, rtol=5e-2), (out_bf16, ref)
    print("KERNEL_OK")
</pallas_src>

<mosaic_0001>
module attributes {stable_mosaic.version = 11 : i64} {
  func.func @_epic_disc_kernel(%arg0: i32, %arg1: memref<8x8x4xf32, #tpu.memory_space<vmem>>, %arg2: memref<8x8x1xf32, #tpu.memory_space<vmem>>, %arg3: memref<8x1xf32, #tpu.memory_space<vmem>>, %arg4: memref<4x32xbf16, #tpu.memory_space<vmem>>, %arg5: memref<1x32xf32, #tpu.memory_space<vmem>>, %arg6: memref<32x32xbf16, #tpu.memory_space<vmem>>, %arg7: memref<1x32xf32, #tpu.memory_space<vmem>>, %arg8: memref<32x32xbf16, #tpu.memory_space<vmem>>, %arg9: memref<1x32xf32, #tpu.memory_space<vmem>>, %arg10: memref<1x32xf32, #tpu.memory_space<vmem>>, %arg11: memref<32x16xbf16, #tpu.memory_space<vmem>>, %arg12: memref<1x16xf32, #tpu.memory_space<vmem>>, %arg13: memref<2x48x32xbf16, #tpu.memory_space<vmem>>, %arg14: memref<2x1x32xf32, #tpu.memory_space<vmem>>, %arg15: memref<2x1x32xf32, #tpu.memory_space<vmem>>, %arg16: memref<2x32x16xbf16, #tpu.memory_space<vmem>>, %arg17: memref<2x1x16xf32, #tpu.memory_space<vmem>>, %arg18: memref<2x32x32xbf16, #tpu.memory_space<vmem>>, %arg19: memref<2x16x32xbf16, #tpu.memory_space<vmem>>, %arg20: memref<2x1x32xf32, #tpu.memory_space<vmem>>, %arg21: memref<2x32x32xbf16, #tpu.memory_space<vmem>>, %arg22: memref<2x1x32xf32, #tpu.memory_space<vmem>>, %arg23: memref<48x32xbf16, #tpu.memory_space<vmem>>, %arg24: memref<1x32xf32, #tpu.memory_space<vmem>>, %arg25: memref<1x32xf32, #tpu.memory_space<vmem>>, %arg26: memref<32x32xbf16, #tpu.memory_space<vmem>>, %arg27: memref<1x32xf32, #tpu.memory_space<vmem>>, %arg28: memref<1x32xf32, #tpu.memory_space<vmem>>, %arg29: memref<1x1xf32, #tpu.memory_space<vmem>>, %arg30: memref<8x1xf32, #tpu.memory_space<vmem>>) attributes {dimension_semantics = [#tpu.dimension_semantics<parallel>], iteration_bounds = array<i64: 1>, scalar_prefetch = 0 : i64, scratch_operands = 0 : i64, tpu.core_type = #tpu.core_type<tc>, window_params = [{transform_indices = @transform_0, window_bounds = array<i64: 8, 8, 4>}, {transform_indices = @transform_1, window_bounds = array<i64: 8, 8, 1>}, {transform_indices = @transform_2, window_bounds = array<i64: 8, 1>}, {pipeline_mode = #tpu.pipeline_mode<synchronous>, transform_indices = @transform_3, window_bounds = array<i64: 4, 32>}, {pipeline_mode = #tpu.pipeline_mode<synchronous>, transform_indices = @transform_4, window_bounds = array<i64: 1, 32>}, {pipeline_mode = #tpu.pipeline_mode<synchronous>, transform_indices = @transform_5, window_bounds = array<i64: 32, 32>}, {pipeline_mode = #tpu.pipeline_mode<synchronous>, transform_indices = @transform_6, window_bounds = array<i64: 1, 32>}, {pipeline_mode = #tpu.pipeline_mode<synchronous>, transform_indices = @transform_7, window_bounds = array<i64: 32, 32>}, {pipeline_mode = #tpu.pipeline_mode<synchronous>, transform_indices = @transform_8, window_bounds = array<i64: 1, 32>}, {pipeline_mode = #tpu.pipeline_mode<synchronous>, transform_indices = @transform_9, window_bounds = array<i64: 1, 32>}, {pipeline_mode = #tpu.pipeline_mode<synchronous>, transform_indices = @transform_10, window_bounds = array<i64: 32, 16>}, {pipeline_mode = #tpu.pipeline_mode<synchronous>, transform_indices = @transform_11, window_bounds = array<i64: 1, 16>}, {pipeline_mode = #tpu.pipeline_mode<synchronous>, transform_indices = @transform_12, window_bounds = array<i64: 2, 48, 32>}, {pipeline_mode = #tpu.pipeline_mode<synchronous>, transform_indices = @transform_13, window_bounds = array<i64: 2, 1, 32>}, {pipeline_mode = #tpu.pipeline_mode<synchronous>, transform_indices = @transform_14, window_bounds = array<i64: 2, 1, 32>}, {pipeline_mode = #tpu.pipeline_mode<synchronous>, transform_indices = @transform_15, window_bounds = array<i64: 2, 32, 16>}, {pipeline_mode = #tpu.pipeline_mode<synchronous>, transform_indices = @transform_16, window_bounds = array<i64: 2, 1, 16>}, {pipeline_mode = #tpu.pipeline_mode<synchronous>, transform_indices = @transform_17, window_bounds = array<i64: 2, 32, 32>}, {pipeline_mode = #tpu.pipeline_mode<synchronous>, transform_indices = @transform_18, window_bounds = array<i64: 2, 16, 32>}, {pipeline_mode = #tpu.pipeline_mode<synchronous>, transform_indices = @transform_19, window_bounds = array<i64: 2, 1, 32>}, {pipeline_mode = #tpu.pipeline_mode<synchronous>, transform_indices = @transform_20, window_bounds = array<i64: 2, 32, 32>}, {pipeline_mode = #tpu.pipeline_mode<synchronous>, transform_indices = @transform_21, window_bounds = array<i64: 2, 1, 32>}, {pipeline_mode = #tpu.pipeline_mode<synchronous>, transform_indices = @transform_22, window_bounds = array<i64: 48, 32>}, {pipeline_mode = #tpu.pipeline_mode<synchronous>, transform_indices = @transform_23, window_bounds = array<i64: 1, 32>}, {pipeline_mode = #tpu.pipeline_mode<synchronous>, transform_indices = @transform_24, window_bounds = array<i64: 1, 32>}, {pipeline_mode = #tpu.pipeline_mode<synchronous>, transform_indices = @transform_25, window_bounds = array<i64: 32, 32>}, {pipeline_mode = #tpu.pipeline_mode<synchronous>, transform_indices = @transform_26, window_bounds = array<i64: 1, 32>}, {pipeline_mode = #tpu.pipeline_mode<synchronous>, transform_indices = @transform_27, window_bounds = array<i64: 1, 32>}, {pipeline_mode = #tpu.pipeline_mode<synchronous>, transform_indices = @transform_28, window_bounds = array<i64: 1, 1>}, {transform_indices = @transform_29, window_bounds = array<i64: 8, 1>}]} {
    %c0 = arith.constant 0 : index
    %c0_0 = arith.constant 0 : index
    %c0_1 = arith.constant 0 : index
    %0 = vector.load %arg1[%c0, %c0_0, %c0_1] : memref<8x8x4xf32, #tpu.memory_space<vmem>>, vector<8x8x4xf32>
    %1 = vector.shape_cast %0 : vector<8x8x4xf32> to vector<64x4xf32>
    %c0_2 = arith.constant 0 : index
    %c0_3 = arith.constant 0 : index
    %2 = vector.load %arg3[%c0_2, %c0_3] : memref<8x1xf32, #tpu.memory_space<vmem>>, vector<8x1xf32>
    %c0_4 = arith.constant 0 : index
    %c0_5 = arith.constant 0 : index
    %c0_6 = arith.constant 0 : index
    %3 = vector.load %arg2[%c0_4, %c0_5, %c0_6] : memref<8x8x1xf32, #tpu.memory_space<vmem>>, vector<8x8x1xf32>
    %c0_7 = arith.constant 0 : index
    %c0_8 = arith.constant 0 : index
    %4 = vector.load %arg4[%c0_7, %c0_8] : memref<4x32xbf16, #tpu.memory_space<vmem>>, vector<4x32xbf16>
    %5 = arith.truncf %1 : vector<64x4xf32> to vector<64x4xbf16>
    %cst = arith.constant dense<0.000000e+00> : vector<64x32xf32>
    %6 = tpu.matmul %5, %4, %cst {dimension_numbers = #tpu.dot_dimension_numbers<[1], [0], [0], [1], [0, 0, 1, 1], [], []>} : vector<64x4xbf16>, vector<4x32xbf16>, vector<64x32xf32> -> vector<64x32xf32>
    %c0_9 = arith.constant 0 : index
    %c0_10 = arith.constant 0 : index
    %7 = vector.load %arg5[%c0_9, %c0_10] : memref<1x32xf32, #tpu.memory_space<vmem>>, vector<1x32xf32>
    %8 = vector.broadcast %7 : vector<1x32xf32> to vector<64x32xf32>
    %9 = arith.addf %6, %8 : vector<64x32xf32>
    %cst_11 = arith.constant 0.00999999977 : f32
    %10 = vector.broadcast %cst_11 : f32 to vector<64x32xf32>
    %11 = arith.mulf %10, %9 : vector<64x32xf32>
    %12 = arith.maximumf %9, %11 : vector<64x32xf32>
    %c0_12 = arith.constant 0 : index
    %c0_13 = arith.constant 0 : index
    %13 = vector.load %arg6[%c0_12, %c0_13] : memref<32x32xbf16, #tpu.memory_space<vmem>>, vector<32x32xbf16>
    %14 = arith.truncf %12 : vector<64x32xf32> to vector<64x32xbf16>
    %cst_14 = arith.constant dense<0.000000e+00> : vector<64x32xf32>
    %15 = tpu.matmul %14, %13, %cst_14 {dimension_numbers = #tpu.dot_dimension_numbers<[1], [0], [0], [1], [0, 0, 1, 1], [], []>} : vector<64x32xbf16>, vector<32x32xbf16>, vector<64x32xf32> -> vector<64x32xf32>
    %c0_15 = arith.constant 0 : index
    %c0_16 = arith.constant 0 : index
    %16 = vector.load %arg7[%c0_15, %c0_16] : memref<1x32xf32, #tpu.memory_space<vmem>>, vector<1x32xf32>
    %17 = vector.broadcast %16 : vector<1x32xf32> to vector<64x32xf32>
    %18 = arith.addf %15, %17 : vector<64x32xf32>
    %19 = arith.addf %18, %12 : vector<64x32xf32>
    %cst_17 = arith.constant 0.00999999977 : f32
    %20 = vector.broadcast %cst_17 : f32 to vector<64x32xf32>
    %21 = arith.mulf %20, %19 : vector<64x32xf32>
    %22 = arith.maximumf %19, %21 : vector<64x32xf32>
    %23 = vector.shape_cast %22 : vector<64x32xf32> to vector<8x8x32xf32>
    %24 = vector.broadcast %3 : vector<8x8x1xf32> to vector<8x8x32xf32>
    %25 = arith.mulf %23, %24 : vector<8x8x32xf32>
    %cst_18 = arith.constant dense<0.000000e+00> : vector<8x32xf32>
    %26 = vector.multi_reduction <add>, %25, %cst_18 [1] : vector<8x8x32xf32> to vector<8x32xf32>
    %c0_19 = arith.constant 0 : index
    %c0_20 = arith.constant 0 : index
    %27 = vector.load %arg8[%c0_19, %c0_20] : memref<32x32xbf16, #tpu.memory_space<vmem>>, vector<32x32xbf16>
    %28 = arith.truncf %26 : vector<8x32xf32> to vector<8x32xbf16>
    %cst_21 = arith.constant dense<0.000000e+00> : vector<8x32xf32>
    %29 = tpu.matmul %28, %27, %cst_21 {dimension_numbers = #tpu.dot_dimension_numbers<[1], [0], [0], [1], [0, 0, 1, 1], [], []>} : vector<8x32xbf16>, vector<32x32xbf16>, vector<8x32xf32> -> vector<8x32xf32>
    %c0_22 = arith.constant 0 : index
    %c0_23 = arith.constant 0 : index
    %30 = vector.load %arg9[%c0_22, %c0_23] : memref<1x32xf32, #tpu.memory_space<vmem>>, vector<1x32xf32>
    %31 = vector.broadcast %2 : vector<8x1xf32> to vector<8x32xf32>
    %32 = vector.broadcast %30 : vector<1x32xf32> to vector<8x32xf32>
    %33 = arith.mulf %31, %32 : vector<8x32xf32>
    %34 = arith.addf %29, %33 : vector<8x32xf32>
    %c0_24 = arith.constant 0 : index
    %c0_25 = arith.constant 0 : index
    %35 = vector.load %arg10[%c0_24, %c0_25] : memref<1x32xf32, #tpu.memory_space<vmem>>, vector<1x32xf32>
    %36 = vector.broadcast %35 : vector<1x32xf32> to vector<8x32xf32>
    %37 = arith.addf %34, %36 : vector<8x32xf32>
    %cst_26 = arith.constant 0.00999999977 : f32
    %38 = vector.broadcast %cst_26 : f32 to vector<8x32xf32>
    %39 = arith.mulf %38, %37 : vector<8x32xf32>
    %40 = arith.maximumf %37, %39 : vector<8x32xf32>
    %c0_27 = arith.constant 0 : index
    %c0_28 = arith.constant 0 : index
    %41 = vector.load %arg11[%c0_27, %c0_28] : memref<32x16xbf16, #tpu.memory_space<vmem>>, vector<32x16xbf16>
    %42 = arith.truncf %40 : vector<8x32xf32> to vector<8x32xbf16>
    %cst_29 = arith.constant dense<0.000000e+00> : vector<8x16xf32>
    %43 = tpu.matmul %42, %41, %cst_29 {dimension_numbers = #tpu.dot_dimension_numbers<[1], [0], [0], [1], [0, 0, 1, 1], [], []>} : vector<8x32xbf16>, vector<32x16xbf16>, vector<8x16xf32> -> vector<8x16xf32>
    %c0_30 = arith.constant 0 : index
    %c0_31 = arith.constant 0 : index
    %44 = vector.load %arg12[%c0_30, %c0_31] : memref<1x16xf32, #tpu.memory_space<vmem>>, vector<1x16xf32>
    %45 = vector.broadcast %44 : vector<1x16xf32> to vector<8x16xf32>
    %46 = arith.addf %43, %45 : vector<8x16xf32>
    %cst_32 = arith.constant 0.00999999977 : f32
    %47 = vector.broadcast %cst_32 : f32 to vector<8x16xf32>
    %48 = arith.mulf %47, %46 : vector<8x16xf32>
    %49 = arith.maximumf %46, %48 : vector<8x16xf32>
    %50 = vector.shape_cast %22 : vector<64x32xf32> to vector<8x8x32xf32>
    %51 = vector.broadcast %3 : vector<8x8x1xf32> to vector<8x8x32xf32>
    %52 = arith.mulf %50, %51 : vector<8x8x32xf32>
    %cst_33 = arith.constant dense<0.000000e+00> : vector<8x32xf32>
    %53 = vector.multi_reduction <add>, %52, %cst_33 [1] : vector<8x8x32xf32> to vector<8x32xf32>
    %54 = tpu.concatenate %53, %49 in 1 : vector<8x32xf32>, vector<8x16xf32> -> vector<8x48xf32>
    %c0_34 = arith.constant 0 : index
    %c0_35 = arith.constant 0 : index
    %c0_36 = arith.constant 0 : index
    %55 = vector.load %arg13[%c0_34, %c0_35, %c0_36] : memref<2x48x32xbf16, #tpu.memory_space<vmem>>, vector<1x48x32xbf16>
    %56 = vector.shape_cast %55 : vector<1x48x32xbf16> to vector<48x32xbf16>
    %57 = arith.truncf %54 : vector<8x48xf32> to vector<8x48xbf16>
    %cst_37 = arith.constant dense<0.000000e+00> : vector<8x32xf32>
    %58 = tpu.matmul %57, %56, %cst_37 {dimension_numbers = #tpu.dot_dimension_numbers<[1], [0], [0], [1], [0, 0, 1, 1], [], []>} : vector<8x48xbf16>, vector<48x32xbf16>, vector<8x32xf32> -> vector<8x32xf32>
    %c0_38 = arith.constant 0 : index
    %c0_39 = arith.constant 0 : index
    %c0_40 = arith.constant 0 : index
    %59 = vector.load %arg14[%c0_38, %c0_39, %c0_40] : memref<2x1x32xf32, #tpu.memory_space<vmem>>, vector<1x1x32xf32>
    %60 = vector.shape_cast %59 : vector<1x1x32xf32> to vector<1x32xf32>
    %61 = vector.broadcast %2 : vector<8x1xf32> to vector<8x32xf32>
    %62 = vector.broadcast %60 : vector<1x32xf32> to vector<8x32xf32>
    %63 = arith.mulf %61, %62 : vector<8x32xf32>
    %64 = arith.addf %58, %63 : vector<8x32xf32>
    %c0_41 = arith.constant 0 : index
    %c0_42 = arith.constant 0 : index
    %c0_43 = arith.constant 0 : index
    %65 = vector.load %arg15[%c0_41, %c0_42, %c0_43] : memref<2x1x32xf32, #tpu.memory_space<vmem>>, vector<1x1x32xf32>
    %66 = vector.shape_cast %65 : vector<1x1x32xf32> to vector<1x32xf32>
    %67 = vector.broadcast %66 : vector<1x32xf32> to vector<8x32xf32>
    %68 = arith.addf %64, %67 : vector<8x32xf32>
    %cst_44 = arith.constant 0.00999999977 : f32
    %69 = vector.broadcast %cst_44 : f32 to vector<8x32xf32>
    %70 = arith.mulf %69, %68 : vector<8x32xf32>
    %71 = arith.maximumf %68, %70 : vector<8x32xf32>
    %c0_45 = arith.constant 0 : index
    %c0_46 = arith.constant 0 : index
    %c0_47 = arith.constant 0 : index
    %72 = vector.load %arg16[%c0_45, %c0_46, %c0_47] : memref<2x32x16xbf16, #tpu.memory_space<vmem>>, vector<1x32x16xbf16>
    %73 = vector.shape_cast %72 : vector<1x32x16xbf16> to vector<32x16xbf16>
    %74 = arith.truncf %71 : vector<8x32xf32> to vector<8x32xbf16>
    %cst_48 = arith.constant dense<0.000000e+00> : vector<8x16xf32>
    %75 = tpu.matmul %74, %73, %cst_48 {dimension_numbers = #tpu.dot_dimension_numbers<[1], [0], [0], [1], [0, 0, 1, 1], [], []>} : vector<8x32xbf16>, vector<32x16xbf16>, vector<8x16xf32> -> vector<8x16xf32>
    %c0_49 = arith.constant 0 : index
    %c0_50 = arith.constant 0 : index
    %c0_51 = arith.constant 0 : index
    %76 = vector.load %arg17[%c0_49, %c0_50, %c0_51] : memref<2x1x16xf32, #tpu.memory_space<vmem>>, vector<1x1x16xf32>
    %77 = vector.shape_cast %76 : vector<1x1x16xf32> to vector<1x16xf32>
    %78 = vector.broadcast %77 : vector<1x16xf32> to vector<8x16xf32>
    %79 = arith.addf %75, %78 : vector<8x16xf32>
    %80 = arith.addf %79, %49 : vector<8x16xf32>
    %cst_52 = arith.constant 0.00999999977 : f32
    %81 = vector.broadcast %cst_52 : f32 to vector<8x16xf32>
    %82 = arith.mulf %81, %80 : vector<8x16xf32>
    %83 = arith.maximumf %80, %82 : vector<8x16xf32>
    %c0_53 = arith.constant 0 : index
    %c0_54 = arith.constant 0 : index
    %c0_55 = arith.constant 0 : index
    %84 = vector.load %arg19[%c0_53, %c0_54, %c0_55] : memref<2x16x32xbf16, #tpu.memory_space<vmem>>, vector<1x16x32xbf16>
    %85 = vector.shape_cast %84 : vector<1x16x32xbf16> to vector<16x32xbf16>
    %86 = arith.truncf %83 : vector<8x16xf32> to vector<8x16xbf16>
    %cst_56 = arith.constant dense<0.000000e+00> : vector<8x32xf32>
    %87 = tpu.matmul %86, %85, %cst_56 {dimension_numbers = #tpu.dot_dimension_numbers<[1], [0], [0], [1], [0, 0, 1, 1], [], []>} : vector<8x16xbf16>, vector<16x32xbf16>, vector<8x32xf32> -> vector<8x32xf32>
    %c0_57 = arith.constant 0 : index
    %c0_58 = arith.constant 0 : index
    %c0_59 = arith.constant 0 : index
    %88 = vector.load %arg18[%c0_57, %c0_58, %c0_59] : memref<2x32x32xbf16, #tpu.memory_space<vmem>>, vector<1x32x32xbf16>
    %89 = vector.shape_cast %88 : vector<1x32x32xbf16> to vector<32x32xbf16>
    %90 = arith.truncf %22 : vector<64x32xf32> to vector<64x32xbf16>
    %cst_60 = arith.constant dense<0.000000e+00> : vector<64x32xf32>
    %91 = tpu.matmul %90, %89, %cst_60 {dimension_numbers = #tpu.dot_dimension_numbers<[1], [0], [0], [1], [0, 0, 1, 1], [], []>} : vector<64x32xbf16>, vector<32x32xbf16>, vector<64x32xf32> -> vector<64x32xf32>
    %92 = vector.shape_cast %91 : vector<64x32xf32> to vector<8x8x32xf32>
    %93 = vector.shape_cast %87 : vector<8x32xf32> to vector<8x1x32xf32>
    %94 = vector.broadcast %93 : vector<8x1x32xf32> to vector<8x8x32xf32>
    %95 = arith.addf %92, %94 : vector<8x8x32xf32>
    %c0_61 = arith.constant 0 : index
    %c0_62 = arith.constant 0 : index
    %c0_63 = arith.constant 0 : index
    %96 = vector.load %arg20[%c0_61, %c0_62, %c0_63] : memref<2x1x32xf32, #tpu.memory_space<vmem>>, vector<1x1x32xf32>
    %97 = vector.shape_cast %96 : vector<1x1x32xf32> to vector<1x32xf32>
    %98 = vector.shape_cast %97 : vector<1x32xf32> to vector<1x1x32xf32>
    %99 = vector.broadcast %98 : vector<1x1x32xf32> to vector<8x8x32xf32>
    %100 = arith.addf %95, %99 : vector<8x8x32xf32>
    %cst_64 = arith.constant 0.00999999977 : f32
    %101 = vector.broadcast %cst_64 : f32 to vector<8x8x32xf32>
    %102 = arith.mulf %101, %100 : vector<8x8x32xf32>
    %103 = arith.maximumf %100, %102 : vector<8x8x32xf32>
    %104 = vector.shape_cast %103 : vector<8x8x32xf32> to vector<64x32xf32>
    %c0_65 = arith.constant 0 : index
    %c0_66 = arith.constant 0 : index
    %c0_67 = arith.constant 0 : index
    %105 = vector.load %arg21[%c0_65, %c0_66, %c0_67] : memref<2x32x32xbf16, #tpu.memory_space<vmem>>, vector<1x32x32xbf16>
    %106 = vector.shape_cast %105 : vector<1x32x32xbf16> to vector<32x32xbf16>
    %107 = arith.truncf %104 : vector<64x32xf32> to vector<64x32xbf16>
    %cst_68 = arith.constant dense<0.000000e+00> : vector<64x32xf32>
    %108 = tpu.matmul %107, %106, %cst_68 {dimension_numbers = #tpu.dot_dimension_numbers<[1], [0], [0], [1], [0, 0, 1, 1], [], []>} : vector<64x32xbf16>, vector<32x32xbf16>, vector<64x32xf32> -> vector<64x32xf32>
    %c0_69 = arith.constant 0 : index
    %c0_70 = arith.constant 0 : index
    %c0_71 = arith.constant 0 : index
    %109 = vector.load %arg22[%c0_69, %c0_70, %c0_71] : memref<2x1x32xf32, #tpu.memory_space<vmem>>, vector<1x1x32xf32>
    %110 = vector.shape_cast %109 : vector<1x1x32xf32> to vector<1x32xf32>
    %111 = vector.broadcast %110 : vector<1x32xf32> to vector<64x32xf32>
    %112 = arith.addf %108, %111 : vector<64x32xf32>
    %113 = arith.addf %112, %22 : vector<64x32xf32>
    %cst_72 = arith.constant 0.00999999977 : f32
    %114 = vector.broadcast %cst_72 : f32 to vector<64x32xf32>
    %115 = arith.mulf %114, %113 : vector<64x32xf32>
    %116 = arith.maximumf %113, %115 : vector<64x32xf32>
    %117 = vector.shape_cast %116 : vector<64x32xf32> to vector<8x8x32xf32>
    %118 = vector.broadcast %3 : vector<8x8x1xf32> to vector<8x8x32xf32>
    %119 = arith.mulf %117, %118 : vector<8x8x32xf32>
    %cst_73 = arith.constant dense<0.000000e+00> : vector<8x32xf32>
    %120 = vector.multi_reduction <add>, %119, %cst_73 [1] : vector<8x8x32xf32> to vector<8x32xf32>
    %121 = tpu.concatenate %120, %83 in 1 : vector<8x32xf32>, vector<8x16xf32> -> vector<8x48xf32>
    %c1 = arith.constant 1 : index
    %c0_74 = arith.constant 0 : index
    %c0_75 = arith.constant 0 : index
    %122 = vector.load %arg13[%c1, %c0_74, %c0_75] : memref<2x48x32xbf16, #tpu.memory_space<vmem>>, vector<1x48x32xbf16>
    %123 = vector.shape_cast %122 : vector<1x48x32xbf16> to vector<48x32xbf16>
    %124 = arith.truncf %121 : vector<8x48xf32> to vector<8x48xbf16>
    %cst_76 = arith.constant dense<0.000000e+00> : vector<8x32xf32>
    %125 = tpu.matmul %124, %123, %cst_76 {dimension_numbers = #tpu.dot_dimension_numbers<[1], [0], [0], [1], [0, 0, 1, 1], [], []>} : vector<8x48xbf16>, vector<48x32xbf16>, vector<8x32xf32> -> vector<8x32xf32>
    %c1_77 = arith.constant 1 : index
    %c0_78 = arith.constant 0 : index
    %c0_79 = arith.constant 0 : index
    %126 = vector.load %arg14[%c1_77, %c0_78, %c0_79] : memref<2x1x32xf32, #tpu.memory_space<vmem>>, vector<1x1x32xf32>
    %127 = vector.shape_cast %126 : vector<1x1x32xf32> to vector<1x32xf32>
    %128 = vector.broadcast %2 : vector<8x1xf32> to vector<8x32xf32>
    %129 = vector.broadcast %127 : vector<1x32xf32> to vector<8x32xf32>
    %130 = arith.mulf %128, %129 : vector<8x32xf32>
    %131 = arith.addf %125, %130 : vector<8x32xf32>
    %c1_80 = arith.constant 1 : index
    %c0_81 = arith.constant 0 : index
    %c0_82 = arith.constant 0 : index
    %132 = vector.load %arg15[%c1_80, %c0_81, %c0_82] : memref<2x1x32xf32, #tpu.memory_space<vmem>>, vector<1x1x32xf32>
    %133 = vector.shape_cast %132 : vector<1x1x32xf32> to vector<1x32xf32>
    %134 = vector.broadcast %133 : vector<1x32xf32> to vector<8x32xf32>
    %135 = arith.addf %131, %134 : vector<8x32xf32>
    %cst_83 = arith.constant 0.00999999977 : f32
    %136 = vector.broadcast %cst_83 : f32 to vector<8x32xf32>
    %137 = arith.mulf %136, %135 : vector<8x32xf32>
    %138 = arith.maximumf %135, %137 : vector<8x32xf32>
    %c1_84 = arith.constant 1 : index
    %c0_85 = arith.constant 0 : index
    %c0_86 = arith.constant 0 : index
    %139 = vector.load %arg16[%c1_84, %c0_85, %c0_86] : memref<2x32x16xbf16, #tpu.memory_space<vmem>>, vector<1x32x16xbf16>
    %140 = vector.shape_cast %139 : vector<1x32x16xbf16> to vector<32x16xbf16>
    %141 = arith.truncf %138 : vector<8x32xf32> to vector<8x32xbf16>
    %cst_87 = arith.constant dense<0.000000e+00> : vector<8x16xf32>
    %142 = tpu.matmul %141, %140, %cst_87 {dimension_numbers = #tpu.dot_dimension_numbers<[1], [0], [0], [1], [0, 0, 1, 1], [], []>} : vector<8x32xbf16>, vector<32x16xbf16>, vector<8x16xf32> -> vector<8x16xf32>
    %c1_88 = arith.constant 1 : index
    %c0_89 = arith.constant 0 : index
    %c0_90 = arith.constant 0 : index
    %143 = vector.load %arg17[%c1_88, %c0_89, %c0_90] : memref<2x1x16xf32, #tpu.memory_space<vmem>>, vector<1x1x16xf32>
    %144 = vector.shape_cast %143 : vector<1x1x16xf32> to vector<1x16xf32>
    %145 = vector.broadcast %144 : vector<1x16xf32> to vector<8x16xf32>
    %146 = arith.addf %142, %145 : vector<8x16xf32>
    %147 = arith.addf %146, %83 : vector<8x16xf32>
    %cst_91 = arith.constant 0.00999999977 : f32
    %148 = vector.broadcast %cst_91 : f32 to vector<8x16xf32>
    %149 = arith.mulf %148, %147 : vector<8x16xf32>
    %150 = arith.maximumf %147, %149 : vector<8x16xf32>
    %c1_92 = arith.constant 1 : index
    %c0_93 = arith.constant 0 : index
    %c0_94 = arith.constant 0 : index
    %151 = vector.load %arg19[%c1_92, %c0_93, %c0_94] : memref<2x16x32xbf16, #tpu.memory_space<vmem>>, vector<1x16x32xbf16>
    %152 = vector.shape_cast %151 : vector<1x16x32xbf16> to vector<16x32xbf16>
    %153 = arith.truncf %150 : vector<8x16xf32> to vector<8x16xbf16>
    %cst_95 = arith.constant dense<0.000000e+00> : vector<8x32xf32>
    %154 = tpu.matmul %153, %152, %cst_95 {dimension_numbers = #tpu.dot_dimension_numbers<[1], [0], [0], [1], [0, 0, 1, 1], [], []>} : vector<8x16xbf16>, vector<16x32xbf16>, vector<8x32xf32> -> vector<8x32xf32>
    %c1_96 = arith.constant 1 : index
    %c0_97 = arith.constant 0 : index
    %c0_98 = arith.constant 0 : index
    %155 = vector.load %arg18[%c1_96, %c0_97, %c0_98] : memref<2x32x32xbf16, #tpu.memory_space<vmem>>, vector<1x32x32xbf16>
    %156 = vector.shape_cast %155 : vector<1x32x32xbf16> to vector<32x32xbf16>
    %157 = arith.truncf %116 : vector<64x32xf32> to vector<64x32xbf16>
    %cst_99 = arith.constant dense<0.000000e+00> : vector<64x32xf32>
    %158 = tpu.matmul %157, %156, %cst_99 {dimension_numbers = #tpu.dot_dimension_numbers<[1], [0], [0], [1], [0, 0, 1, 1], [], []>} : vector<64x32xbf16>, vector<32x32xbf16>, vector<64x32xf32> -> vector<64x32xf32>
    %159 = vector.shape_cast %158 : vector<64x32xf32> to vector<8x8x32xf32>
    %160 = vector.shape_cast %154 : vector<8x32xf32> to vector<8x1x32xf32>
    %161 = vector.broadcast %160 : vector<8x1x32xf32> to vector<8x8x32xf32>
    %162 = arith.addf %159, %161 : vector<8x8x32xf32>
    %c1_100 = arith.constant 1 : index
    %c0_101 = arith.constant 0 : index
    %c0_102 = arith.constant 0 : index
    %163 = vector.load %arg20[%c1_100, %c0_101, %c0_102] : memref<2x1x32xf32, #tpu.memory_space<vmem>>, vector<1x1x32xf32>
    %164 = vector.shape_cast %163 : vector<1x1x32xf32> to vector<1x32xf32>
    %165 = vector.shape_cast %164 : vector<1x32xf32> to vector<1x1x32xf32>
    %166 = vector.broadcast %165 : vector<1x1x32xf32> to vector<8x8x32xf32>
    %167 = arith.addf %162, %166 : vector<8x8x32xf32>
    %cst_103 = arith.constant 0.00999999977 : f32
    %168 = vector.broadcast %cst_103 : f32 to vector<8x8x32xf32>
    %169 = arith.mulf %168, %167 : vector<8x8x32xf32>
    %170 = arith.maximumf %167, %169 : vector<8x8x32xf32>
    %171 = vector.shape_cast %170 : vector<8x8x32xf32> to vector<64x32xf32>
    %c1_104 = arith.constant 1 : index
    %c0_105 = arith.constant 0 : index
    %c0_106 = arith.constant 0 : index
    %172 = vector.load %arg21[%c1_104, %c0_105, %c0_106] : memref<2x32x32xbf16, #tpu.memory_space<vmem>>, vector<1x32x32xbf16>
    %173 = vector.shape_cast %172 : vector<1x32x32xbf16> to vector<32x32xbf16>
    %174 = arith.truncf %171 : vector<64x32xf32> to vector<64x32xbf16>
    %cst_107 = arith.constant dense<0.000000e+00> : vector<64x32xf32>
    %175 = tpu.matmul %174, %173, %cst_107 {dimension_numbers = #tpu.dot_dimension_numbers<[1], [0], [0], [1], [0, 0, 1, 1], [], []>} : vector<64x32xbf16>, vector<32x32xbf16>, vector<64x32xf32> -> vector<64x32xf32>
    %c1_108 = arith.constant 1 : index
    %c0_109 = arith.constant 0 : index
    %c0_110 = arith.constant 0 : index
    %176 = vector.load %arg22[%c1_108, %c0_109, %c0_110] : memref<2x1x32xf32, #tpu.memory_space<vmem>>, vector<1x1x32xf32>
    %177 = vector.shape_cast %176 : vector<1x1x32xf32> to vector<1x32xf32>
    %178 = vector.broadcast %177 : vector<1x32xf32> to vector<64x32xf32>
    %179 = arith.addf %175, %178 : vector<64x32xf32>
    %180 = arith.addf %179, %116 : vector<64x32xf32>
    %cst_111 = arith.constant 0.00999999977 : f32
    %181 = vector.broadcast %cst_111 : f32 to vector<64x32xf32>
    %182 = arith.mulf %181, %180 : vector<64x32xf32>
    %183 = arith.maximumf %180, %182 : vector<64x32xf32>
    %184 = vector.shape_cast %183 : vector<64x32xf32> to vector<8x8x32xf32>
    %185 = vector.broadcast %3 : vector<8x8x1xf32> to vector<8x8x32xf32>
    %186 = arith.mulf %184, %185 : vector<8x8x32xf32>
    %cst_112 = arith.constant dense<0.000000e+00> : vector<8x32xf32>
    %187 = vector.multi_reduction <add>, %186, %cst_112 [1] : vector<8x8x32xf32> to vector<8x32xf32>
    %188 = tpu.concatenate %187, %150 in 1 : vector<8x32xf32>, vector<8x16xf32> -> vector<8x48xf32>
    %c0_113 = arith.constant 0 : index
    %c0_114 = arith.constant 0 : index
    %189 = vector.load %arg23[%c0_113, %c0_114] : memref<48x32xbf16, #tpu.memory_space<vmem>>, vector<48x32xbf16>
    %190 = arith.truncf %188 : vector<8x48xf32> to vector<8x48xbf16>
    %cst_115 = arith.constant dense<0.000000e+00> : vector<8x32xf32>
    %191 = tpu.matmul %190, %189, %cst_115 {dimension_numbers = #tpu.dot_dimension_numbers<[1], [0], [0], [1], [0, 0, 1, 1], [], []>} : vector<8x48xbf16>, vector<48x32xbf16>, vector<8x32xf32> -> vector<8x32xf32>
    %c0_116 = arith.constant 0 : index
    %c0_117 = arith.constant 0 : index
    %192 = vector.load %arg24[%c0_116, %c0_117] : memref<1x32xf32, #tpu.memory_space<vmem>>, vector<1x32xf32>
    %193 = vector.broadcast %2 : vector<8x1xf32> to vector<8x32xf32>
    %194 = vector.broadcast %192 : vector<1x32xf32> to vector<8x32xf32>
    %195 = arith.mulf %193, %194 : vector<8x32xf32>
    %196 = arith.addf %191, %195 : vector<8x32xf32>
    %c0_118 = arith.constant 0 : index
    %c0_119 = arith.constant 0 : index
    %197 = vector.load %arg25[%c0_118, %c0_119] : memref<1x32xf32, #tpu.memory_space<vmem>>, vector<1x32xf32>
    %198 = vector.broadcast %197 : vector<1x32xf32> to vector<8x32xf32>
    %199 = arith.addf %196, %198 : vector<8x32xf32>
    %cst_120 = arith.constant 0.00999999977 : f32
    %200 = vector.broadcast %cst_120 : f32 to vector<8x32xf32>
    %201 = arith.mulf %200, %199 : vector<8x32xf32>
    %202 = arith.maximumf %199, %201 : vector<8x32xf32>
    %c0_121 = arith.constant 0 : index
    %c0_122 = arith.constant 0 : index
    %203 = vector.load %arg26[%c0_121, %c0_122] : memref<32x32xbf16, #tpu.memory_space<vmem>>, vector<32x32xbf16>
    %204 = arith.truncf %202 : vector<8x32xf32> to vector<8x32xbf16>
    %cst_123 = arith.constant dense<0.000000e+00> : vector<8x32xf32>
    %205 = tpu.matmul %204, %203, %cst_123 {dimension_numbers = #tpu.dot_dimension_numbers<[1], [0], [0], [1], [0, 0, 1, 1], [], []>} : vector<8x32xbf16>, vector<32x32xbf16>, vector<8x32xf32> -> vector<8x32xf32>
    %c0_124 = arith.constant 0 : index
    %c0_125 = arith.constant 0 : index
    %206 = vector.load %arg27[%c0_124, %c0_125] : memref<1x32xf32, #tpu.memory_space<vmem>>, vector<1x32xf32>
    %207 = vector.broadcast %206 : vector<1x32xf32> to vector<8x32xf32>
    %208 = arith.addf %205, %207 : vector<8x32xf32>
    %209 = arith.addf %208, %202 : vector<8x32xf32>
    %cst_126 = arith.constant 0.00999999977 : f32
    %210 = vector.broadcast %cst_126 : f32 to vector<8x32xf32>
    %211 = arith.mulf %210, %209 : vector<8x32xf32>
    %212 = arith.maximumf %209, %211 : vector<8x32xf32>
    %c0_127 = arith.constant 0 : index
    %c0_128 = arith.constant 0 : index
    %213 = vector.load %arg28[%c0_127, %c0_128] : memref<1x32xf32, #tpu.memory_space<vmem>>, vector<1x32xf32>
    %214 = vector.broadcast %213 : vector<1x32xf32> to vector<8x32xf32>
    %215 = arith.mulf %212, %214 : vector<8x32xf32>
    %cst_129 = arith.constant dense<0.000000e+00> : vector<8xf32>
    %216 = vector.multi_reduction <add>, %215, %cst_129 [1] : vector<8x32xf32> to vector<8xf32>
    %217 = vector.shape_cast %216 : vector<8xf32> to vector<8x1xf32>
    %c0_130 = arith.constant 0 : index
    %c0_131 = arith.constant 0 : index
    %218 = vector.load %arg29[%c0_130, %c0_131] : memref<1x1xf32, #tpu.memory_space<vmem>>, vector<1x1xf32>
    %219 = vector.broadcast %218 : vector<1x1xf32> to vector<8x1xf32>
    %220 = arith.addf %217, %219 : vector<8x1xf32>
    %c0_132 = arith.constant 0 : index
    %c0_133 = arith.constant 0 : index
    %221 = vector.load %arg30[%c0_132, %c0_133] : memref<8x1xf32, #tpu.memory_space<vmem>>, vector<8x1xf32>
    tpu.vector_store %arg30[%c0_132, %c0_133], %220 {strides = array<i32>} : memref<8x1xf32, #tpu.memory_space<vmem>>, vector<8x1xf32>,
    return
  }
  func.func @transform_0(%arg0: i32) -> (i32, i32, i32) {
    %c0_i32 = arith.constant 0 : i32
    %c0_i32_0 = arith.constant 0 : i32
    %c0_i32_1 = arith.constant 0 : i32
    return %arg0, %c0_i32, %c0_i32_0 : i32, i32, i32
  }
  func.func @transform_1(%arg0: i32) -> (i32, i32, i32) {
    %c0_i32 = arith.constant 0 : i32
    %c0_i32_0 = arith.constant 0 : i32
    %c0_i32_1 = arith.constant 0 : i32
    return %arg0, %c0_i32, %c0_i32_0 : i32, i32, i32
  }
  func.func @transform_2(%arg0: i32) -> (i32, i32) {
    %c0_i32 = arith.constant 0 : i32
    %c0_i32_0 = arith.constant 0 : i32
    return %arg0, %c0_i32 : i32, i32
  }
  func.func @transform_3(%arg0: i32) -> (i32, i32) {
    %c0_i32 = arith.constant 0 : i32
    %c0_i32_0 = arith.constant 0 : i32
    %c0_i32_1 = arith.constant 0 : i32
    return %c0_i32, %c0_i32_0 : i32, i32
  }
  func.func @transform_4(%arg0: i32) -> (i32, i32) {
    %c0_i32 = arith.constant 0 : i32
    %c0_i32_0 = arith.constant 0 : i32
    %c0_i32_1 = arith.constant 0 : i32
    return %c0_i32, %c0_i32_0 : i32, i32
  }
  func.func @transform_5(%arg0: i32) -> (i32, i32) {
    %c0_i32 = arith.constant 0 : i32
    %c0_i32_0 = arith.constant 0 : i32
    %c0_i32_1 = arith.constant 0 : i32
    return %c0_i32, %c0_i32_0 : i32, i32
  }
  func.func @transform_6(%arg0: i32) -> (i32, i32) {
    %c0_i32 = arith.constant 0 : i32
    %c0_i32_0 = arith.constant 0 : i32
    %c0_i32_1 = arith.constant 0 : i32
    return %c0_i32, %c0_i32_0 : i32, i32
  }
  func.func @transform_7(%arg0: i32) -> (i32, i32) {
    %c0_i32 = arith.constant 0 : i32
    %c0_i32_0 = arith.constant 0 : i32
    %c0_i32_1 = arith.constant 0 : i32
    return %c0_i32, %c0_i32_0 : i32, i32
  }
  func.func @transform_8(%arg0: i32) -> (i32, i32) {
    %c0_i32 = arith.constant 0 : i32
    %c0_i32_0 = arith.constant 0 : i32
    %c0_i32_1 = arith.constant 0 : i32
    return %c0_i32, %c0_i32_0 : i32, i32
  }
  func.func @transform_9(%arg0: i32) -> (i32, i32) {
    %c0_i32 = arith.constant 0 : i32
    %c0_i32_0 = arith.constant 0 : i32
    %c0_i32_1 = arith.constant 0 : i32
    return %c0_i32, %c0_i32_0 : i32, i32
  }
  func.func @transform_10(%arg0: i32) -> (i32, i32) {
    %c0_i32 = arith.constant 0 : i32
    %c0_i32_0 = arith.constant 0 : i32
    %c0_i32_1 = arith.constant 0 : i32
    return %c0_i32, %c0_i32_0 : i32, i32
  }
  func.func @transform_11(%arg0: i32) -> (i32, i32) {
    %c0_i32 = arith.constant 0 : i32
    %c0_i32_0 = arith.constant 0 : i32
    %c0_i32_1 = arith.constant 0 : i32
    return %c0_i32, %c0_i32_0 : i32, i32
  }
  func.func @transform_12(%arg0: i32) -> (i32, i32, i32) {
    %c0_i32 = arith.constant 0 : i32
    %c0_i32_0 = arith.constant 0 : i32
    %c0_i32_1 = arith.constant 0 : i32
    %c0_i32_2 = arith.constant 0 : i32
    return %c0_i32, %c0_i32_0, %c0_i32_1 : i32, i32, i32
  }
  func.func @transform_13(%arg0: i32) -> (i32, i32, i32) {
    %c0_i32 = arith.constant 0 : i32
    %c0_i32_0 = arith.constant 0 : i32
    %c0_i32_1 = arith.constant 0 : i32
    %c0_i32_2 = arith.constant 0 : i32
    return %c0_i32, %c0_i32_0, %c0_i32_1 : i32, i32, i32
  }
  func.func @transform_14(%arg0: i32) -> (i32, i32, i32) {
    %c0_i32 = arith.constant 0 : i32
    %c0_i32_0 = arith.constant 0 : i32
    %c0_i32_1 = arith.constant 0 : i32
    %c0_i32_2 = arith.constant 0 : i32
    return %c0_i32, %c0_i32_0, %c0_i32_1 : i32, i32, i32
  }
  func.func @transform_15(%arg0: i32) -> (i32, i32, i32) {
    %c0_i32 = arith.constant 0 : i32
    %c0_i32_0 = arith.constant 0 : i32
    %c0_i32_1 = arith.constant 0 : i32
    %c0_i32_2 = arith.constant 0 : i32
    return %c0_i32, %c0_i32_0, %c0_i32_1 : i32, i32, i32
  }
  func.func @transform_16(%arg0: i32) -> (i32, i32, i32) {
    %c0_i32 = arith.constant 0 : i32
    %c0_i32_0 = arith.constant 0 : i32
    %c0_i32_1 = arith.constant 0 : i32
    %c0_i32_2 = arith.constant 0 : i32
    return %c0_i32, %c0_i32_0, %c0_i32_1 : i32, i32, i32
  }
  func.func @transform_17(%arg0: i32) -> (i32, i32, i32) {
    %c0_i32 = arith.constant 0 : i32
    %c0_i32_0 = arith.constant 0 : i32
    %c0_i32_1 = arith.constant 0 : i32
    %c0_i32_2 = arith.constant 0 : i32
    return %c0_i32, %c0_i32_0, %c0_i32_1 : i32, i32, i32
  }
  func.func @transform_18(%arg0: i32) -> (i32, i32, i32) {
    %c0_i32 = arith.constant 0 : i32
    %c0_i32_0 = arith.constant 0 : i32
    %c0_i32_1 = arith.constant 0 : i32
    %c0_i32_2 = arith.constant 0 : i32
    return %c0_i32, %c0_i32_0, %c0_i32_1 : i32, i32, i32
  }
  func.func @transform_19(%arg0: i32) -> (i32, i32, i32) {
    %c0_i32 = arith.constant 0 : i32
    %c0_i32_0 = arith.constant 0 : i32
    %c0_i32_1 = arith.constant 0 : i32
    %c0_i32_2 = arith.constant 0 : i32
    return %c0_i32, %c0_i32_0, %c0_i32_1 : i32, i32, i32
  }
  func.func @transform_20(%arg0: i32) -> (i32, i32, i32) {
    %c0_i32 = arith.constant 0 : i32
    %c0_i32_0 = arith.constant 0 : i32
    %c0_i32_1 = arith.constant 0 : i32
    %c0_i32_2 = arith.constant 0 : i32
    return %c0_i32, %c0_i32_0, %c0_i32_1 : i32, i32, i32
  }
  func.func @transform_21(%arg0: i32) -> (i32, i32, i32) {
    %c0_i32 = arith.constant 0 : i32
    %c0_i32_0 = arith.constant 0 : i32
    %c0_i32_1 = arith.constant 0 : i32
    %c0_i32_2 = arith.constant 0 : i32
    return %c0_i32, %c0_i32_0, %c0_i32_1 : i32, i32, i32
  }
  func.func @transform_22(%arg0: i32) -> (i32, i32) {
    %c0_i32 = arith.constant 0 : i32
    %c0_i32_0 = arith.constant 0 : i32
    %c0_i32_1 = arith.constant 0 : i32
    return %c0_i32, %c0_i32_0 : i32, i32
  }
  func.func @transform_23(%arg0: i32) -> (i32, i32) {
    %c0_i32 = arith.constant 0 : i32
    %c0_i32_0 = arith.constant 0 : i32
    %c0_i32_1 = arith.constant 0 : i32
    return %c0_i32, %c0_i32_0 : i32, i32
  }
  func.func @transform_24(%arg0: i32) -> (i32, i32) {
    %c0_i32 = arith.constant 0 : i32
    %c0_i32_0 = arith.constant 0 : i32
    %c0_i32_1 = arith.constant 0 : i32
    return %c0_i32, %c0_i32_0 : i32, i32
  }
  func.func @transform_25(%arg0: i32) -> (i32, i32) {
    %c0_i32 = arith.constant 0 : i32
    %c0_i32_0 = arith.constant 0 : i32
    %c0_i32_1 = arith.constant 0 : i32
    return %c0_i32, %c0_i32_0 : i32, i32
  }
  func.func @transform_26(%arg0: i32) -> (i32, i32) {
    %c0_i32 = arith.constant 0 : i32
    %c0_i32_0 = arith.constant 0 : i32
    %c0_i32_1 = arith.constant 0 : i32
    return %c0_i32, %c0_i32_0 : i32, i32
  }
  func.func @transform_27(%arg0: i32) -> (i32, i32) {
    %c0_i32 = arith.constant 0 : i32
    %c0_i32_0 = arith.constant 0 : i32
    %c0_i32_1 = arith.constant 0 : i32
    return %c0_i32, %c0_i32_0 : i32, i32
  }
  func.func @transform_28(%arg0: i32) -> (i32, i32) {
    %c0_i32 = arith.constant 0 : i32
    %c0_i32_0 = arith.constant 0 : i32
    %c0_i32_1 = arith.constant 0 : i32
    return %c0_i32, %c0_i32_0 : i32, i32
  }
  func.func @transform_29(%arg0: i32) -> (i32, i32) {
    %c0_i32 = arith.constant 0 : i32
    %c0_i32_0 = arith.constant 0 : i32
    return %arg0, %c0_i32 : i32, i32
  }
}

</mosaic_0001>

<bundles_post_ra>
// kernel: tpu_custom_call.1
= control target key start
LH: loop header
LB: loop body
LE: loop exit
PB: predicated region body
PF: predicated region fallthrough
CT: control target
= control target key end

     0   :  { %s2608_s3 = smov 3   ;;  %vm167_vm0 = vcmask 1041408   ;;  %vm154_vm1 = vcmask 31744   ;;  %s2609_s10 = smov 5   ;;  %v2610_v16 = vmov 0   ;;  %vm279_vm2 = vcmask 261120   ;;  %s3113_s0 = inlined_call_operand.smem [shape: u32[30], index: -1, kind: input, shape index: {}] }
   0x1   :  { %s2185_s6 = sld [smem:[%s3113_s0 + %s2608_s3]]   ;;  %2575 = vset.pattern.permute.xlu0 %v2610_v16  ;;  %s2611_s14 = smov 1   ;;  %2576 = vset.pattern.permute.xlu1 %v2610_v16  ;;  %vm2616_vm3 = vmmov 0   ;;  %vm526_vm4 = vcmask 1041409   ;;  %vm528_vm5 = vcmask 1042434   ;;  %vm530_vm6 = vcmask 1043459  }
   0x2   :  { %s1_s9 = sld [smem:[%s3113_s0]]   ;;  %s2612_s18 = smov 2   ;;  %vm532_vm7 = vcmask 1044484   ;;  %vm534_vm8 = vcmask 1045509   ;;  %vm536_vm9 = vcmask 1046534   ;;  %vm538_vm10 = vcmask 1047559  }
   0x3   :  { %s2187_s13 = sld [smem:[%s3113_s0 + %s2609_s10]]   ;;  %s2613_s22 = smov 4   ;;  %vm729_vm11 = vcmask 392192   ;;  %vm862_vm12 = vcmask 130048   ;;  %vm2177_vm13 = vcmask 7168  }
   0x4   :  { %s2183_s17 = sld [smem:[%s3113_s0 + %s2611_s14]]   ;;  %s2614_s26 = smov 7  }
   0x5   :  { %s2184_s21 = sld [smem:[%s3113_s0 + %s2612_s18]]   ;;  %s2617_s30 = smov 10  }
   0x6   :  { %s2186_s25 = sld [smem:[%s3113_s0 + %s2613_s22]]   ;;  %s2618_s4 = smov 6  }
   0x7   :  { %v142_v0 = vld [vmem:[%s2185_s6] sm:$0x3]  ;;  %s2189_s29 = sld [smem:[%s3113_s0 + %s2614_s26]]   ;;  %s2619_s8 = smov 8  }
   0x8   :  { %v125_v1 = vld [vmem:[%s1_s9] sm:$0xff]  ;;  %v126_v2 = vld [vmem:[%s1_s9 + $0x8] sm:$0xff]  ;;  %2540 = vmatprep.subr.msk.bf16.mxu0 %vm167_vm0, %v142_v0  ;;  %v169_v3 = vsel %vm167_vm0, %v142_v0, 0  ;;  %v127_v5 = vld [vmem:[%s1_s9 + $0x10] sm:$0xff]  ;;  %v2615_v0 = vmov 0.0   ;;  %s2702_s3 = sld [smem:[%s3113_s0 + %s2617_s30]]   ;;  %s2620_s12 = smov 9  }
   0x9   :  { %v143_v4 = vpack.c.bf16 %v126_v2, %v125_v1  ;;  %v128_v6 = vld [vmem:[%s1_s9 + $0x18] sm:$0xff]  ;;  %v129_v7 = vld [vmem:[%s1_s9 + $0x20] sm:$0xff]  ;;  %2389 = vmatpush3.bf16.msra.mxu0 %v169_v3  ;;  %v130_v9 = vld [vmem:[%s1_s9 + $0x28] sm:$0xff]  ;;  %s2188_s7 = sld [smem:[%s3113_s0 + %s2618_s4]]   ;;  %s2621_s16 = smov 12  }
   0xa   :  { %v144_v8 = vpack.c.bf16 %v128_v6, %v127_v5  ;;  %v145_v10 = vpack.c.bf16 %v130_v9, %v129_v7  ;;  %v131_v11 = vld [vmem:[%s1_s9 + $0x30] sm:$0xff]  ;;  %v132_v12 = vld [vmem:[%s1_s9 + $0x38] sm:$0xff]  ;;  %v2577_v14 = vld [vmem:[%s2187_s13] sm:$0xff]   ;;  %2410 = vmatprep.subr.bf16.mxu0 %v2615_v0  ;;  %s2190_s11 = sld [smem:[%s3113_s0 + %s2619_s8]]   ;;  %s2622_s20 = smov 11  }
   0xb   :  { %2390 = vmatprep.mubr.msk.bf16.mxu0 %vm154_vm1, %v143_v4  ;;  %v146_v13 = vpack.c.bf16 %v132_v12, %v131_v11  ;;  %2398 = vmatprep.subr.bf16.mxu1 %v2577_v14  ;;  %v2578_v15 = vld [vmem:[%s2187_s13 + $0x8] sm:$0xff]   ;;  %v134_v17 = vld [vmem:[%s2183_s17] sm:$0xff]  ;;  %v136_v18 = vld [vmem:[%s2183_s17 + $0x10] sm:$0xff]  ;;  %s2191_s15 = sld [smem:[%s3113_s0 + %s2620_s12]]   ;;  %s2623_s24 = smov 32  }
   0xc   :  { %2391 = vmatmul.mubr.msk.bf16.vlgmr.msra.gmra.mrb[0].mxu0 %vm154_vm1, %v144_v8  ;;  %2399 = vmatpush3.bf16.msra.mxu1 %v2577_v14  ;;  %v135_v19 = vld [vmem:[%s2183_s17 + $0x8] sm:$0xff]  ;;  %v137_v20 = vld [vmem:[%s2183_s17 + $0x18] sm:$0xff]  ;;  %v138_v21 = vld [vmem:[%s2183_s17 + $0x20] sm:$0xff]  ;;  %s2804_s19 = sld [smem:[%s3113_s0 + %s2621_s16]]   ;;  %s2633_s30 = smov 21  }
   0xd   :  { %2394 = vmatprep.mubr.msk.bf16.mxu0 %vm154_vm1, %v145_v10  ;;  %2400 = vmatprep.subr.bf16.mxu1 %v2578_v15  ;;  %v139_v22 = vld [vmem:[%s2183_s17 + $0x28] sm:$0xff]  ;;  %v140_v23 = vld [vmem:[%s2183_s17 + $0x30] sm:$0xff]  ;;  %v141_v24 = vld [vmem:[%s2183_s17 + $0x38] sm:$0xff]  ;;  %s2193_s23 = sld [smem:[%s3113_s0 + %s2622_s20]]   ;;  %s2630_s20 = smov 20  }
   0xe   :  { %383 = vperm.xlu0 %2575, %v134_v17   ;;  %393 = vperm.xlu1 %2576, %v136_v18   ;;  %v133_v25 = vld [vmem:[%s2184_s21] sm:$0xff]  ;;  %v2580_v1 = vld [vmem:[%s2189_s29 + $0x8] sm:$0xff]   ;;  %s2932_s4 = sld [smem:[%s3113_s0 + %s2633_s30]]   ;;  %s2635_s5 = smov 25  }
   0xf   :  { %v2212_v26 = vld [vmem:[%s2186_s25] ss:$0 sm:$0xff]  ;;  %s2624_s25 = smov 15   ;;  %s3053_s8 = sld [smem:[%s3113_s0 + %s2635_s5]]  }
  0x10   :  { %2401 = vmatpush3.bf16.msra.mxu1 %v2578_v15  ;;  %v2579_v63 = vld [vmem:[%s2189_s29] sm:$0xff]   ;;  %s2823_s28 = sld [smem:[%s3113_s0 + %s2624_s25]]   ;;  %s2625_s29 = smov 17  }
  0x11   :  { %2418 = vmatprep.subr.bf16.mxu1 %v2615_v0  ;;  %2411 = vmatpush3.bf16.msra.mxu0 %v2579_v63  ;;  %v2581_v2 = vld [vmem:[%s2702_s3] sm:$0xff]   ;;  %s2829_s2 = sld [smem:[%s3113_s0 + %s2625_s29]]   ;;  %s2632_s25 = smov 19  }
  0x12   :  { %388 = vperm.xlu0 %2575, %v135_v19   ;;  %398 = vperm.xlu1 %2576, %v137_v20   ;;  %v2217_v4 = vld [vmem:[%s2188_s7] ss:$0 sm:$0xff]  ;;  %s2627_s7 = smov 14   ;;  %s2896_s29 = sld [smem:[%s3113_s0 + %s2632_s25]]  }
  0x13   :  { %2412 = vmatprep.subr.bf16.mxu0 %v2615_v0  ;;  %s2842_s10 = sld [smem:[%s3113_s0 + %s2627_s7]]   ;;  %s2636_s9 = smov 23  }
  0x14   :  { %2395 = vmatmul.mubr.msk.bf16.gmra.mrb[4].mxu0 %vm154_vm1, %v146_v13  ;;  %s2205_s12 = sld [smem:[%s3113_s0 + %s2636_s9]]   ;;  %s2637_s13 = smov 24  }
  0x15   :  { %2414 = vmatprep.mubr.msk.bf16.mxu0 %vm2616_vm3, %v2615_v0  ;;  %2413 = vmatpush3.bf16.msra.mxu0 %v2580_v1  ;;  %s2206_s16 = sld [smem:[%s3113_s0 + %s2637_s13]]   ;;  %s2638_s17 = smov 28  }
  0x16   :  { %403 = vperm.xlu0 %2575, %v138_v21   ;;  %408 = vperm.xlu1 %2576, %v139_v22   ;;  %s2210_s21 = sld [smem:[%s3113_s0 + %s2638_s17]]   ;;  %s2639_s22 = smov 26  }
  0x17   :  { %2426 = vmatprep.subr.bf16.mxu0 %v2615_v0  ;;  %s2208_s26 = sld [smem:[%s3113_s0 + %s2639_s22]]   ;;  %s2640_s27 = smov 27  }
  0x18   :  { %s2209_s1 = sld [smem:[%s3113_s0 + %s2640_s27]]  }
  0x1a   :  { %413 = vperm.xlu0 %2575, %v140_v23   ;;  %418 = vperm.xlu1 %2576, %v141_v24  }
  0x1e   :  { %500 = vperm.xlu0 %2575, %v133_v25  }
  0x8d   :  { %v2709_v3 = vpop.permute.xlu0 %383  ;;  %v2711_v8 = vpop.permute.xlu1 %393 }
  0x91   :  { %v2713_v14 = vpop.permute.xlu0 %388  ;;  %v2719_v23 = vpop.permute.xlu1 %398 }
  0xdf   :  { %v2392_v27 = vpop.f32.mrb[0].mxu0 }
  0xe0   :  { %v214_v28 = vadd.f32 %v2392_v27, %v2212_v26  ;;  %v205_v29 = vpop.f32.mrb[1].mxu0 }
  0xe1   :  { %v206_v30 = vadd.f32 %v2212_v26, %v205_v29  ;;  %v2393_v31 = vpop.f32.mrb[2].mxu0 }
  0xe2   :  { %v217_v32 = vadd.f32 %v2393_v31, %v2212_v26  ;;  %v208_v33 = vpop.f32.mrb[3].mxu0  ;;  %v238_v36 = vmul.f32 0.01, %v214_v28  ;;  %v2727_v31 = vpop.permute.xlu0 %403 }
  0xe3   :  { %v236_v34 = vmul.f32 0.01, %v206_v30  ;;  %v209_v35 = vadd.f32 %v2212_v26, %v208_v33 }
  0xe4   :  { %v239_v37 = vmul.f32 0.01, %v217_v32  ;;  %v246_v43 = vmax.f32 %v214_v28, %v238_v36 }
  0xe5   :  { %v237_v38 = vmul.f32 0.01, %v209_v35  ;;  %v244_v40 = vmax.f32 %v206_v30, %v236_v34 }
  0xe6   :  { %v2669_v39 = vmax.f32 %v217_v32, %v239_v37 }
  0xe7   :  { %v2671_v41 = vmax.f32 %v209_v35, %v237_v38  ;;  %v2396_v42 = vpop.f32.mrb[4].mxu0 }
  0xe8   :  { %v230_v44 = vadd.f32 %v2396_v42, %v2212_v26  ;;  %v221_v45 = vpop.f32.mrb[5].mxu0  ;;  %v257_v49 = vpack.c.bf16 %v2669_v39, %v246_v43 }
  0xe9   :  { %v222_v46 = vadd.f32 %v2212_v26, %v221_v45  ;;  %v2397_v47 = vpop.f32.mrb[6].mxu0  ;;  %v256_v48 = vpack.c.bf16 %v2671_v41, %v244_v40 }
  0xea   :  { %v233_v50 = vadd.f32 %v2397_v47, %v2212_v26  ;;  %v224_v51 = vpop.f32.mrb[7].mxu0  ;;  %v242_v54 = vmul.f32 0.01, %v230_v44 }
  0xeb   :  { %v240_v52 = vmul.f32 0.01, %v222_v46  ;;  %v225_v53 = vadd.f32 %v2212_v26, %v224_v51  ;;  %2402 = vmatprep.mubr.msk.bf16.mxu1 %vm279_vm2, %v256_v48  ;;  %v2742_v51 = vpop.permute.xlu1 %408 }
  0xec   :  { %v243_v55 = vmul.f32 0.01, %v233_v50  ;;  %2403 = vmatmul.mubr.msk.bf16.vlgmr.msra.gmra.mrb[0].mxu1 %vm279_vm2, %v257_v49  ;;  %v250_v60 = vmax.f32 %v230_v44, %v242_v54 }
  0xed   :  { %v241_v56 = vmul.f32 0.01, %v225_v53  ;;  %v2679_v58 = vmax.f32 %v222_v46, %v240_v52  ;;  %2419 = vmatpush3.bf16.msra.mxu1 %v2581_v2 }
  0xee   :  { %v2677_v57 = vmax.f32 %v233_v50, %v243_v55  ;;  %2420 = vmatprep.subr.bf16.mxu1 %v2615_v0 }
  0xef   :  { %v2681_v59 = vmax.f32 %v225_v53, %v241_v56 }
  0xf0   :  { %v259_v62 = vpack.c.bf16 %v2677_v57, %v250_v60 }
  0xf1   :  { %v258_v61 = vpack.c.bf16 %v2681_v59, %v2679_v58 }
  0xf3   :  { %2406 = vmatprep.mubr.msk.bf16.mxu1 %vm279_vm2, %v258_v61  ;;  %v2747_v61 = vpop.permute.xlu0 %413 }
  0xf4   :  { %2407 = vmatmul.mubr.msk.bf16.gmra.mrb[4].mxu1 %vm279_vm2, %v259_v62 }
  0xf5   :  { %2422 = vmatprep.mubr.msk.bf16.mxu1 %vm2616_vm3, %v2615_v0 }
 0x1bf   :  { %v2404_v5 = vpop.f32.mrb[0].mxu1 }
 0x1c0   :  { %v335_v6 = vadd.f32 %v2404_v5, %v2217_v4  ;;  %v326_v7 = vpop.f32.mrb[1].mxu1 }
 0x1c1   :  { %v327_v9 = vadd.f32 %v2217_v4, %v326_v7  ;;  %v2405_v10 = vpop.f32.mrb[2].mxu1 }
 0x1c2   :  { %v359_v11 = vadd.f32 %v335_v6, %v246_v43  ;;  %v338_v12 = vadd.f32 %v2405_v10, %v2217_v4  ;;  %v329_v13 = vpop.f32.mrb[3].mxu1 }
 0x1c3   :  { %v357_v15 = vadd.f32 %v327_v9, %v244_v40  ;;  %v330_v16 = vadd.f32 %v2217_v4, %v329_v13 }
 0x1c4   :  { %v367_v17 = vmul.f32 0.01, %v359_v11  ;;  %v360_v18 = vadd.f32 %v338_v12, %v2669_v39 }
 0x1c5   :  { %v365_v19 = vmul.f32 0.01, %v357_v15  ;;  %v358_v20 = vadd.f32 %v330_v16, %v2671_v41 }
 0x1c6   :  { %v2717_v21 = vmax.f32 %v359_v11, %v367_v17  ;;  %v368_v22 = vmul.f32 0.01, %v360_v18  ;;  %v2759_v17 = vpop.permute.xlu1 %418 }
 0x1c7   :  { %v2721_v24 = vmax.f32 %v357_v15, %v365_v19  ;;  %v366_v25 = vmul.f32 0.01, %v358_v20  ;;  %v2408_v26 = vpop.f32.mrb[4].mxu1 }
 0x1c8   :  { %v423_v27 = vmul.f32 %v2711_v8, %v2717_v21  ;;  %v2725_v28 = vmax.f32 %v360_v18, %v368_v22  ;;  %v351_v29 = vadd.f32 %v2408_v26, %v2217_v4  ;;  %v342_v30 = vpop.f32.mrb[5].mxu1 }
 0x1c9   :  { %v421_v32 = vmul.f32 %v2709_v3, %v2721_v24  ;;  %v2731_v33 = vmax.f32 %v358_v20, %v366_v25  ;;  %v343_v34 = vadd.f32 %v2217_v4, %v342_v30  ;;  %v2409_v35 = vpop.f32.mrb[6].mxu1 }
 0x1ca   :  { %v443_v36 = vsel %vm279_vm2, %v423_v27, 0.0  ;;  %v424_v37 = vmul.f32 %v2719_v23, %v2725_v28  ;;  %v363_v38 = vadd.f32 %v351_v29, %v250_v60  ;;  %v345_v39 = vpop.f32.mrb[7].mxu1  ;;  %v354_v47 = vadd.f32 %v2409_v35, %v2217_v4 }
 0x1cb   :  { %v444_v40 = vrot.slane %v443_v36, 4  ;;  %v429_v41 = vsel %vm279_vm2, %v421_v32, 0.0  ;;  %v422_v42 = vmul.f32 %v2713_v14, %v2731_v33  ;;  %v361_v43 = vadd.f32 %v343_v34, %v2679_v58 }
 0x1cc   :  { %v430_v44 = vrot.slane %v429_v41, 4  ;;  %v450_v45 = vsel %vm279_vm2, %v424_v37, 0.0  ;;  %v371_v46 = vmul.f32 0.01, %v363_v38  ;;  %v364_v56 = vadd.f32 %v354_v47, %v2677_v57 }
 0x1cd   :  { %v445_v48 = vadd.f32 %v444_v40, %v443_v36  ;;  %v451_v49 = vrot.slane %v450_v45, 4  ;;  %v436_v50 = vsel %vm279_vm2, %v422_v42, 0.0  ;;  %v369_v52 = vmul.f32 0.01, %v361_v43 }
 0x1ce   :  { %v431_v53 = vadd.f32 %v430_v44, %v429_v41  ;;  %v437_v54 = vrot.slane %v436_v50, 4  ;;  %v2744_v55 = vmax.f32 %v363_v38, %v371_v46  ;;  %v346_v63 = vadd.f32 %v2217_v4, %v345_v39 }
 0x1cf   :  { %v446_v60 = vrot.slane %v445_v48, 2  ;;  %v452_v58 = vadd.f32 %v451_v49, %v450_v45  ;;  %v2749_v62 = vmax.f32 %v361_v43, %v369_v52  ;;  %v372_v6 = vmul.f32 0.01, %v364_v56 }
 0x1d0   :  { %v432_v1 = vrot.slane %v431_v53, 2  ;;  %v438_v2 = vadd.f32 %v437_v54, %v436_v50  ;;  %v427_v5 = vmul.f32 %v2747_v61, %v2744_v55  ;;  %v362_v57 = vadd.f32 %v346_v63, %v2681_v59 }
 0x1d1   :  { %v447_v7 = vadd.f32 %v446_v60, %v445_v48  ;;  %v453_v9 = vrot.slane %v452_v58, 2  ;;  %v425_v10 = vmul.f32 %v2727_v31, %v2749_v62  ;;  %v2757_v15 = vmax.f32 %v364_v56, %v372_v6 }
 0x1d2   :  { %v433_v11 = vadd.f32 %v432_v1, %v431_v53  ;;  %v439_v12 = vrot.slane %v438_v2, 2  ;;  %v471_v13 = vsel %vm279_vm2, %v427_v5, 0.0  ;;  %v370_v59 = vmul.f32 0.01, %v362_v57 }
 0x1d3   :  { %v454_v4 = vadd.f32 %v453_v9, %v452_v58  ;;  %v472_v16 = vrot.slane %v471_v13, 4  ;;  %v457_v18 = vsel %vm279_vm2, %v425_v10, 0.0  ;;  %v428_v22 = vmul.f32 %v2759_v17, %v2757_v15 }
 0x1d4   :  { %v440_v19 = vadd.f32 %v439_v12, %v438_v2  ;;  %v458_v20 = vrot.slane %v457_v18, 4  ;;  %v434_v25 = vrot.slane %v433_v11, 1  ;;  %v448_v27 = vrot.slane %v447_v7, 1 }
 0x1d5   :  { %v473_v26 = vadd.f32 %v472_v16, %v471_v13  ;;  %v478_v32 = vsel %vm279_vm2, %v428_v22, 0.0  ;;  %v455_v34 = vrot.slane %v454_v4, 1  ;;  %v2765_v39 = vmax.f32 %v362_v57, %v370_v59 }
 0x1d6   :  { %v441_v29 = vrot.slane %v440_v19, 1  ;;  %v459_v30 = vadd.f32 %v458_v20, %v457_v18  ;;  %v479_v35 = vrot.slane %v478_v32, 4  ;;  %v435_v40 = vadd.f32 %v434_v25, %v433_v11 }
 0x1d7   :  { %v474_v37 = vrot.slane %v473_v26, 2  ;;  %v449_v42 = vadd.f32 %v448_v27, %v447_v7  ;;  %v426_v44 = vmul.f32 %v2742_v51, %v2765_v39  ;;  %v456_v45 = vadd.f32 %v455_v34, %v454_v4 }
 0x1d8   :  { %v442_v36 = vadd.f32 %v441_v29, %v440_v19  ;;  %v460_v38 = vrot.slane %v459_v30, 2  ;;  %v480_v41 = vadd.f32 %v479_v35, %v478_v32  ;;  %v489_v54 = vpack.c.bf16 %v435_v40, %v435_v40 }
 0x1d9   :  { %v475_v49 = vadd.f32 %v474_v37, %v473_v26  ;;  %v464_v52 = vsel %vm279_vm2, %v426_v44, 0.0  ;;  %v491_v5 = vpack.c.bf16 %v449_v42, %v449_v42  ;;  %v492_v12 = vpack.c.bf16 %v456_v45, %v456_v45 }
 0x1da   :  { %v461_v43 = vadd.f32 %v460_v38, %v459_v30  ;;  %v490_v46 = vpack.c.bf16 %v442_v36, %v442_v36  ;;  %v481_v47 = vrot.slane %v480_v41, 2  ;;  %v683_v48 = vsel %vm526_vm4, %v442_v36, %v435_v40 }
 0x1db   :  { %v684_v53 = vsel %vm528_vm5, %v449_v42, %v683_v48  ;;  %v465_v60 = vrot.slane %v464_v52, 4  ;;  %v476_v6 = vrot.slane %v475_v49, 1  ;;  %v518_v9 = vunpack.c.l.b16 %v489_v54  ;;  %v2224_v48 = vld [vmem:[%s2190_s11] ss:$0 sm:$0xff]  ;;  %s2628_s11 = smov 18  }
 0x1dc   :  { %v462_v50 = vrot.slane %v461_v43, 1  ;;  %v482_v56 = vadd.f32 %v481_v47, %v480_v41  ;;  %v685_v58 = vsel %vm530_vm6, %v456_v45, %v684_v53  ;;  %v519_v1 = vunpack.c.l.b16 %v490_v46  ;;  %v2582_v46 = vld [vmem:[%s2702_s3 + $0x8] sm:$0xff]   ;;  %v2795_v47 = vpop.permute.xlu0 %500  ;;  %s2626_s3 = smov 13   ;;  %s2867_s14 = sld [smem:[%s3113_s0 + %s2628_s11]]  }
 0x1dd   :  { %v466_v2 = vadd.f32 %v465_v60, %v464_v52  ;;  %v520_v16 = vunpack.c.l.b16 %v491_v5  ;;  %v477_v18 = vadd.f32 %v476_v6, %v475_v49  ;;  %v521_v26 = vunpack.c.l.b16 %v492_v12  ;;  %2421 = vmatpush3.bf16.msra.mxu1 %v2582_v46  ;;  %v2228_v52 = vld [vmem:[%s2191_s15] ss:$0 sm:$0xff]  ;;  %v2584_v6 = vld [vmem:[%s2804_s19 + $0x8] sm:$0xff]   ;;  %s2837_s6 = sld [smem:[%s3113_s0 + %s2626_s3]]   ;;  %s2629_s15 = smov 16  }
 0x1de   :  { %v463_v63 = vadd.f32 %v462_v50, %v461_v43  ;;  %v483_v10 = vrot.slane %v482_v56, 1  ;;  %v527_v13 = vsel %vm526_vm4, %v519_v1, %v518_v9  ;;  %2436 = vmatprep.subr.bf16.mxu1 %v2615_v0  ;;  %v509_v49 = vmul.f32 %v2224_v48, %v2795_v47  ;;  %v2583_v5 = vld [vmem:[%s2804_s19] sm:$0xff]   ;;  %s2873_s18 = sld [smem:[%s3113_s0 + %s2629_s15]]   ;;  %s2641_s3 = smov 29  }
 0x1df   :  { %v467_v57 = vrot.slane %v466_v2, 2  ;;  %v529_v22 = vsel %vm528_vm5, %v520_v16, %v527_v13  ;;  %v495_v27 = vpack.c.bf16 %v477_v18, %v477_v18  ;;  %v2229_v9 = vld [vmem:[%s2193_s23] ss:$0 sm:$0xff]  ;;  %v913_v46 = vpack.c.bf16 %v2757_v15, %v2744_v55  ;;  %s2886_s23 = sld [smem:[%s3113_s0 + %s2630_s20]]  }
 0x1e0   :  { %v686_v7 = vsel %vm532_vm7, %v463_v63, %v685_v58  ;;  %v493_v11 = vpack.c.bf16 %v463_v63, %v463_v63  ;;  %v484_v19 = vadd.f32 %v483_v10, %v482_v56  ;;  %v531_v29 = vsel %vm530_vm6, %v521_v26, %v529_v22  ;;  %v2586_v22 = vld [vmem:[%s2823_s28] sm:$0xff]  }
 0x1e1   :  { %v468_v4 = vadd.f32 %v467_v57, %v466_v2  ;;  %v524_v40 = vunpack.c.l.b16 %v495_v27  ;;  %v2588_v26 = vld [vmem:[%s2829_s2] sm:$0xff]  }
 0x1e2   :  { %v522_v25 = vunpack.c.l.b16 %v493_v11  ;;  %v496_v30 = vpack.c.bf16 %v484_v19, %v484_v19  ;;  %v2590_v48 = vld [vmem:[%s2867_s14] sm:$0xff]  }
 0x1e3   :  { %v469_v20 = vrot.slane %v468_v4, 1 }
 0x1e4   :  { %v533_v35 = vsel %vm532_vm7, %v522_v25, %v531_v29  ;;  %v525_v41 = vunpack.c.l.b16 %v496_v30  ;;  %v2587_v25 = vld [vmem:[%s2823_s28 + $0x8] sm:$0xff]   ;;  %v2238_v30 = vld [vmem:[%s2842_s10] ss:$0 sm:$0xff] }
 0x1e5   :  { %v470_v59 = vadd.f32 %v469_v20, %v468_v4 }
 0x1e7   :  { %v494_v32 = vpack.c.bf16 %v470_v59, %v470_v59  ;;  %v687_v34 = vsel %vm534_vm8, %v470_v59, %v686_v7  ;;  %v2585_v7 = vld [vmem:[%s2804_s19 + $0x10] sm:$0xff]   ;;  %v2233_v59 = vld [vmem:[%s2837_s6] ss:$0 sm:$0xff] }
 0x1e8   :  { %v688_v36 = vsel %vm536_vm9, %v477_v18, %v687_v34  ;;  %v710_v27 = vmul.f32 %v2233_v59, %v2795_v47 }
 0x1e9   :  { %v523_v37 = vunpack.c.l.b16 %v494_v32  ;;  %v689_v38 = vsel %vm538_vm10, %v484_v19, %v688_v36 }
 0x1eb   :  { %v535_v42 = vsel %vm534_vm8, %v523_v37, %v533_v35 }
 0x1ec   :  { %v537_v43 = vsel %vm536_vm9, %v524_v40, %v535_v42  ;;  %v2589_v42 = vld [vmem:[%s2829_s2 + $0x8] sm:$0xff]  }
 0x1ed   :  { %v539_v44 = vsel %vm538_vm10, %v525_v41, %v537_v43  ;;  %v910_v43 = vpack.c.bf16 %v2731_v33, %v2721_v24 }
 0x1ee   :  { %v540_v45 = vpack.c.b16 %v539_v44, %v539_v44  ;;  %v911_v44 = vpack.c.bf16 %v2725_v28, %v2717_v21 }
 0x1f0   :  { %2415 = vmatmul.mubr.msk.bf16.vlgmr.msra.gmra.mrb[8].mxu0 %vm279_vm2, %v540_v45  ;;  %v912_v45 = vpack.c.bf16 %v2765_v39, %v2749_v62 }
 0x1f1   :  { %2432 = vmatprep.mubr.msk.bf16.mxu0 %vm2616_vm3, %v2615_v0  ;;  %2427 = vmatpush3.bf16.msra.mxu0 %v2583_v5 }
 0x1f2   :  { %2428 = vmatprep.subr.bf16.mxu0 %v2615_v0 }
 0x1f5   :  { %2429 = vmatpush3.bf16.msra.mxu0 %v2584_v6 }
 0x1f6   :  { %2430 = vmatprep.subr.bf16.mxu0 %v2615_v0 }
 0x1f9   :  { %2431 = vmatpush3.bf16.msra.mxu0 %v2585_v7 }
 0x1fa   :  { %2444 = vmatprep.subr.bf16.mxu0 %v2615_v0 }
 0x2c3   :  { %v590_v50 = vpop.f32.mrb[8].mxu0 }
 0x2c4   :  { %v591_v53 = vadd.f32 %v590_v50, %v509_v49  ;;  %v2416_v54 = vpop.f32.mrb[9].mxu0  ;;  %v2239_v49 = vld [vmem:[%s2873_s18] ss:$0 sm:$0xff] }
 0x2c5   :  { %v593_v56 = vpop.f32.mrb[10].mxu0 }
 0x2c6   :  { %v603_v60 = vadd.f32 %v2228_v52, %v591_v53  ;;  %v2417_v58 = vpop.f32.mrb[11].mxu0 }
 0x2c8   :  { %v604_v63 = vmul.f32 0.01, %v603_v60 }
 0x2ca   :  { %v605_v1 = vmax.f32 %v603_v60, %v604_v63 }
 0x2cc   :  { %v610_v2 = vpack.c.bf16 %v605_v1, %v605_v1 }
 0x2ce   :  { %2423 = vmatmul.mubr.msk.bf16.vlgmr.msra.gmra.mrb[8].mxu1 %vm279_vm2, %v610_v2 }
 0x2cf   :  { %2440 = vmatprep.mubr.msk.bf16.mxu1 %vm2616_vm3, %v2615_v0  ;;  %2437 = vmatpush3.bf16.msra.mxu1 %v2586_v22 }
 0x2d0   :  { %2438 = vmatprep.subr.bf16.mxu1 %v2615_v0 }
 0x2d3   :  { %2439 = vmatpush3.bf16.msra.mxu1 %v2587_v25 }
 0x2d4   :  { %2450 = vmatprep.subr.bf16.mxu1 %v2588_v26 }
 0x3a1   :  { %v667_v10 = vpop.f32.mrb[8].mxu1 }
 0x3a2   :  { %v668_v57 = vadd.f32 %v2229_v9, %v667_v10  ;;  %v2424_v11 = vpop.f32.mrb[9].mxu1 }
 0x3a3   :  { %v670_v12 = vpop.f32.mrb[10].mxu1 }
 0x3a4   :  { %v673_v13 = vmul.f32 0.01, %v668_v57  ;;  %v2425_v4 = vpop.f32.mrb[11].mxu1  ;;  %v2591_v12 = vld [vmem:[%s2886_s23] sm:$0xff]  }
 0x3a5   :  { %v2631_v4 = vmov 1966171168  }
 0x3a6   :  { %v674_v16 = vmax.f32 %v668_v57, %v673_v13  ;;  %v2592_v13 = vld [vmem:[%s2886_s23 + $0x8] sm:$0xff]  }
 0x3a8   :  { %692 = vrot.lane.b32.xlu1 %v674_v16, %s2623_s24 }
 0x41a   :  { %v693_v18 = vpop.permute.xlu1 %692 }
 0x41b   :  { %v695_v19 = vsel %vm279_vm2, %v689_v38, %v693_v18  ;;  %v1008_v18 = vlaneseq }
 0x41c   :  { %v702_v20 = vpack.c.bf16 %v695_v19, %v695_v19 }
 0x41e   :  { %2433 = vmatmul.mubr.msk.bf16.vlgmr.msra.gmra.mrb[12].mxu0 %vm729_vm11, %v702_v20  ;;  %v1009_v20 = vshrl.u32 %v1008_v18, 7 }
 0x41f   :  { %2446 = vmatprep.mubr.msk.bf16.mxu0 %vm2616_vm3, %v2615_v0  ;;  %2445 = vmatpush3.bf16.msra.mxu0 %v2590_v48  ;;  %v2251_v48 = vld [vmem:[%s2896_s29] ss:$0 sm:$0xff] }
 0x420   :  { %2462 = vmatprep.subr.bf16.mxu0 %v2591_v12 }
 0x4f1   :  { %v767_v29 = vpop.f32.mrb[12].mxu0 }
 0x4f2   :  { %v768_v32 = vadd.f32 %v767_v29, %v710_v27  ;;  %v2434_v34 = vpop.f32.mrb[13].mxu0  ;;  %v2899_v29 = vsub.s32 0, %v1009_v20 }
 0x4f3   :  { %v770_v35 = vpop.f32.mrb[14].mxu0 }
 0x4f4   :  { %v780_v36 = vadd.f32 %v2238_v30, %v768_v32  ;;  %v2435_v37 = vpop.f32.mrb[15].mxu0 }
 0x4f6   :  { %v781_v38 = vmul.f32 0.01, %v780_v36 }
 0x4f8   :  { %v782_v40 = vmax.f32 %v780_v36, %v781_v38 }
 0x4fa   :  { %v787_v41 = vpack.c.bf16 %v782_v40, %v782_v40 }
 0x4fc   :  { %2441 = vmatmul.mubr.msk.bf16.vlgmr.msra.gmra.mrb[12].mxu1 %vm279_vm2, %v787_v41 }
 0x4fd   :  { %2451 = vmatpush3.bf16.msra.mxu1 %v2588_v26  ;;  %2454 = vmatprep.mubr.msk.bf16.mxu1 %vm279_vm2, %v910_v43 }
 0x4fe   :  { %2452 = vmatprep.subr.bf16.mxu1 %v2589_v42 }
 0x501   :  { %2453 = vmatpush3.bf16.msra.mxu1 %v2589_v42 }
 0x502   :  { %2474 = vmatprep.subr.bf16.mxu1 %v2615_v0 }
 0x504   :  { %2455 = vmatmul.mubr.msk.bf16.vlgmr.msra.gmra.mrb[16].mxu1 %vm279_vm2, %v911_v44 }
 0x505   :  { %2458 = vmatprep.mubr.msk.bf16.mxu1 %vm279_vm2, %v912_v45 }
 0x50c   :  { %2459 = vmatmul.mubr.msk.bf16.gmra.mrb[20].mxu1 %vm279_vm2, %v913_v46 }
 0x50d   :  { %2480 = vmatprep.mubr.msk.bf16.mxu1 %vm2616_vm3, %v2615_v0 }
 0x5cf   :  { %v844_v50 = vpop.f32.mrb[12].mxu1 }
 0x5d0   :  { %v845_v52 = vadd.f32 %v2239_v49, %v844_v50  ;;  %v2442_v53 = vpop.f32.mrb[13].mxu1 }
 0x5d1   :  { %v847_v54 = vpop.f32.mrb[14].mxu1 }
 0x5d2   :  { %v850_v56 = vadd.f32 %v845_v52, %v674_v16  ;;  %v2443_v60 = vpop.f32.mrb[15].mxu1  ;;  %v1006_v16 = vunpack.c.l.s4 %v2631_v4 }
 0x5d4   :  { %v851_v58 = vmul.f32 0.01, %v850_v56  ;;  %v1007_v19 = vunpack.c.0.s8 %v1006_v16 }
 0x5d6   :  { %v2876_v63 = vmax.f32 %v850_v56, %v851_v58  ;;  %v2891_v22 = vsub.s32 %v1007_v19, %v1009_v20 }
 0x5d7   :  { %v2456_v1 = vpop.f32.mrb[16].mxu1 }
 0x5d8   :  { %1341 = vrot.lane.b32.xlu0 %v2876_v63, %s2623_s24  ;;  %v855_v2 = vpack.c.bf16 %v2876_v63, %v2876_v63  ;;  %v972_v5 = vpop.f32.mrb[17].mxu1 }
 0x5d9   :  { %v2457_v6 = vpop.f32.mrb[18].mxu1 }
 0x5da   :  { %2447 = vmatmul.mubr.msk.bf16.vlgmr.msra.gmra.mrb[16].mxu0 %vm862_vm12, %v855_v2  ;;  %v975_v7 = vpop.f32.mrb[19].mxu1 }
 0x5db   :  { %2463 = vmatpush3.bf16.msra.mxu0 %v2591_v12 }
 0x5dc   :  { %2464 = vmatprep.subr.bf16.mxu0 %v2592_v13 }
 0x5df   :  { %v2460_v9 = vpop.f32.mrb[20].mxu1  ;;  %2465 = vmatpush3.bf16.msra.mxu0 %v2592_v13 }
 0x5e0   :  { %v988_v10 = vpop.f32.mrb[21].mxu1  ;;  %2484 = vmatprep.subr.bf16.mxu0 %v2615_v0 }
 0x5e1   :  { %v2461_v57 = vpop.f32.mrb[22].mxu1 }
 0x5e2   :  { %v991_v11 = vpop.f32.mrb[23].mxu1 }
 0x6ad   :  { %v900_v25 = vpop.f32.mrb[16].mxu0 }
 0x6ae   :  { %v1004_v26 = vcombine.high %v900_v25, %v900_v25  ;;  %v1011_v59 = vrot.slane %v900_v25, %v2891_v22  ;;  %v2448_v27 = vpop.f32.mrb[17].mxu0 }
 0x6af   :  { %v903_v30 = vpop.f32.mrb[18].mxu0 }
 0x6b0   :  { %v1018_v32 = vrot.slane %v1004_v26, %v2891_v22  ;;  %v1019_v34 = vcombine.high %v1011_v59, %v1011_v59  ;;  %v1027_v35 = vrot.slane %v1011_v59, %v2891_v22  ;;  %v2449_v36 = vpop.f32.mrb[19].mxu0 }
 0x6b2   :  { %v1020_v37 = vcombine.high %v1018_v32, %v1018_v32  ;;  %v1034_v38 = vrot.slane %v1018_v32, %v2891_v22  ;;  %v1041_v40 = vrot.slane %v1019_v34, %v2891_v22  ;;  %v1049_v41 = vcombine.high %v1027_v35, %v1027_v35 }
 0x6b3   :  { %v1056_v42 = vrot.slane %v1027_v35, %v2899_v29 }
 0x6b4   :  { %v1048_v43 = vrot.slane %v1020_v37, %v2891_v22  ;;  %v1050_v44 = vcombine.high %v1034_v38, %v1034_v38  ;;  %v1051_v45 = vcombine.high %v1041_v40, %v1041_v40  ;;  %v1060_v46 = vrot.slane %v1041_v40, %v2899_v29 }
 0x6b5   :  { %v1064_v49 = vrot.slane %v1049_v41, %v2899_v29  ;;  %v1072_v50 = vrot.slane %v1034_v38, %v2899_v29  ;;  %v1093_v52 = vadd.f32 %v1056_v42, %v972_v5 }
 0x6b6   :  { %v1052_v53 = vcombine.high %v1048_v43, %v1048_v43  ;;  %v1068_v54 = vrot.slane %v1051_v45, %v2899_v29  ;;  %v1076_v56 = vrot.slane %v1048_v43, %v2899_v29  ;;  %v1080_v60 = vrot.slane %v1050_v44, %v2899_v29 }
 0x6b7   :  { %v1094_v58 = vadd.f32 %v1060_v46, %v975_v7  ;;  %v1095_v2 = vadd.f32 %v2456_v1, %v1064_v49  ;;  %v1097_v12 = vadd.f32 %v1072_v50, %v988_v10  ;;  %v1108_v13 = vadd.f32 %v2251_v48, %v1093_v52  ;;  %v2593_v49 = vld [vmem:[%s2804_s19 + $0x18] sm:$0xff]   ;;  %v2594_v50 = vld [vmem:[%s2804_s19 + $0x20] sm:$0xff]   ;;  %v2595_v52 = vld [vmem:[%s2804_s19 + $0x28] sm:$0xff]   ;;  %s2634_s19 = smov 22  }
 0x6b8   :  { %v1084_v4 = vrot.slane %v1052_v53, %v2899_v29  ;;  %v1096_v16 = vadd.f32 %v2457_v6, %v1068_v54  ;;  %v1098_v18 = vadd.f32 %v1076_v56, %v991_v11  ;;  %v1099_v19 = vadd.f32 %v2460_v9, %v1080_v60  ;;  %2475 = vmatpush3.bf16.msra.mxu1 %v2593_v49  ;;  %v2596_v53 = vld [vmem:[%s2823_s28 + $0x10] sm:$0xff]   ;;  %v2252_v54 = vld [vmem:[%s2932_s4] ss:$0 sm:$0xff] }
 0x6b9   :  { %v1110_v20 = vadd.f32 %v2251_v48, %v1095_v2  ;;  %v1109_v25 = vadd.f32 %v2251_v48, %v1094_v58  ;;  %v1116_v26 = vmul.f32 0.01, %v1108_v13  ;;  %v1112_v5 = vadd.f32 %v2251_v48, %v1097_v12  ;;  %2476 = vmatprep.subr.bf16.mxu1 %v2615_v0 }
 0x6ba   :  { %v1111_v59 = vadd.f32 %v2251_v48, %v1096_v16  ;;  %v1113_v27 = vadd.f32 %v2251_v48, %v1098_v18  ;;  %v1100_v30 = vadd.f32 %v2461_v57, %v1084_v4  ;;  %v1114_v32 = vadd.f32 %v2251_v48, %v1099_v19 }
 0x6bb   :  { %v1118_v34 = vmul.f32 0.01, %v1110_v20  ;;  %v1117_v35 = vmul.f32 0.01, %v1109_v25  ;;  %v1120_v36 = vmul.f32 0.01, %v1112_v5  ;;  %v1124_v40 = vmax.f32 %v1108_v13, %v1116_v26 }
 0x6bc   :  { %v1119_v7 = vmul.f32 0.01, %v1111_v59  ;;  %v1121_v1 = vmul.f32 0.01, %v1113_v27  ;;  %v1115_v10 = vadd.f32 %v2251_v48, %v1100_v30  ;;  %v1122_v37 = vmul.f32 0.01, %v1114_v32  ;;  %2477 = vmatpush3.bf16.msra.mxu1 %v2594_v50 }
 0x6bd   :  { %v1126_v38 = vmax.f32 %v1110_v20, %v1118_v34  ;;  %v1125_v6 = vmax.f32 %v1109_v25, %v1117_v35  ;;  %v1128_v11 = vmax.f32 %v1112_v5, %v1120_v36  ;;  %2478 = vmatprep.subr.bf16.mxu1 %v2615_v0 }
 0x6be   :  { %v1127_v9 = vmax.f32 %v1111_v59, %v1119_v7  ;;  %v1129_v41 = vmax.f32 %v1113_v27, %v1121_v1  ;;  %v1123_v42 = vmul.f32 0.01, %v1115_v10  ;;  %v1130_v45 = vmax.f32 %v1114_v32, %v1122_v37 }
 0x6bf   :  { %v1136_v43 = vpack.c.bf16 %v1125_v6, %v1124_v40 }
 0x6c0   :  { %v1137_v57 = vpack.c.bf16 %v1127_v9, %v1126_v38  ;;  %v1138_v44 = vpack.c.bf16 %v1129_v41, %v1128_v11  ;;  %v1131_v46 = vmax.f32 %v1115_v10, %v1123_v42  ;;  %2479 = vmatpush3.bf16.msra.mxu1 %v2595_v52 }
 0x6c1   :  { %2466 = vmatprep.mubr.msk.bf16.mxu0 %vm279_vm2, %v1136_v43  ;;  %2492 = vmatprep.subr.bf16.mxu1 %v2615_v0 }
 0x6c2   :  { %2467 = vmatmul.mubr.msk.bf16.vlgmr.msra.gmra.mrb[20].mxu0 %vm279_vm2, %v1137_v57  ;;  %v1139_v48 = vpack.c.bf16 %v1131_v46, %v1130_v45 }
 0x6c3   :  { %2470 = vmatprep.mubr.msk.bf16.mxu0 %vm279_vm2, %v1138_v44  ;;  %2485 = vmatpush3.bf16.msra.mxu0 %v2596_v53 }
 0x6c4   :  { %2486 = vmatprep.subr.bf16.mxu0 %v2615_v0 }
 0x6ca   :  { %2471 = vmatmul.mubr.msk.bf16.gmra.mrb[24].mxu0 %vm279_vm2, %v1139_v48 }
 0x6cb   :  { %2488 = vmatprep.mubr.msk.bf16.mxu0 %vm2616_vm3, %v2615_v0 }
 0x795   :  { %v2468_v56 = vpop.f32.mrb[20].mxu0 }
 0x796   :  { %v1214_v60 = vadd.f32 %v2468_v56, %v2252_v54  ;;  %v1205_v58 = vpop.f32.mrb[21].mxu0 }
 0x797   :  { %v1206_v2 = vadd.f32 %v2252_v54, %v1205_v58  ;;  %v2469_v12 = vpop.f32.mrb[22].mxu0 }
 0x798   :  { %v1238_v13 = vadd.f32 %v1214_v60, %v2717_v21  ;;  %v1217_v4 = vadd.f32 %v2469_v12, %v2252_v54  ;;  %v1208_v16 = vpop.f32.mrb[23].mxu0 }
 0x799   :  { %v1236_v18 = vadd.f32 %v1206_v2, %v2721_v24  ;;  %v1209_v19 = vadd.f32 %v2252_v54, %v1208_v16 }
 0x79a   :  { %v1246_v20 = vmul.f32 0.01, %v1238_v13  ;;  %v1239_v25 = vadd.f32 %v1217_v4, %v2725_v28 }
 0x79b   :  { %v1244_v26 = vmul.f32 0.01, %v1236_v18  ;;  %v1237_v5 = vadd.f32 %v1209_v19, %v2731_v33 }
 0x79c   :  { %v2939_v59 = vmax.f32 %v1238_v13, %v1246_v20  ;;  %v1247_v27 = vmul.f32 0.01, %v1239_v25 }
 0x79d   :  { %v2941_v30 = vmax.f32 %v1236_v18, %v1244_v26  ;;  %v1245_v32 = vmul.f32 0.01, %v1237_v5  ;;  %v2472_v34 = vpop.f32.mrb[24].mxu0 }
 0x79e   :  { %v1262_v21 = vmul.f32 %v2939_v59, %v2711_v8  ;;  %v2945_v35 = vmax.f32 %v1239_v25, %v1247_v27  ;;  %v1230_v24 = vadd.f32 %v2472_v34, %v2252_v54  ;;  %v1221_v36 = vpop.f32.mrb[25].mxu0 }
 0x79f   :  { %v1260_v28 = vmul.f32 %v2941_v30, %v2709_v3  ;;  %v2949_v7 = vmax.f32 %v1237_v5, %v1245_v32  ;;  %v1222_v33 = vadd.f32 %v2252_v54, %v1221_v36  ;;  %v2473_v1 = vpop.f32.mrb[26].mxu0 }
 0x7a0   :  { %v1282_v10 = vsel %vm279_vm2, %v1262_v21, 0.0  ;;  %v1263_v37 = vmul.f32 %v2945_v35, %v2719_v23  ;;  %v1242_v38 = vadd.f32 %v1230_v24, %v2744_v55  ;;  %v1224_v40 = vpop.f32.mrb[27].mxu0  ;;  %v1233_v44 = vadd.f32 %v2473_v1, %v2252_v54 }
 0x7a1   :  { %v1283_v6 = vrot.slane %v1282_v10, 4  ;;  %v1268_v9 = vsel %vm279_vm2, %v1260_v28, 0.0  ;;  %v1261_v11 = vmul.f32 %v2949_v7, %v2713_v14  ;;  %v1240_v41 = vadd.f32 %v1222_v33, %v2749_v62 }
 0x7a2   :  { %v1269_v42 = vrot.slane %v1268_v9, 4  ;;  %v1289_v43 = vsel %vm279_vm2, %v1263_v37, 0.0  ;;  %v1250_v57 = vmul.f32 0.01, %v1242_v38  ;;  %v1243_v52 = vadd.f32 %v1233_v44, %v2757_v15 }
 0x7a3   :  { %v1290_v45 = vrot.slane %v1289_v43, 4  ;;  %v1275_v46 = vsel %vm279_vm2, %v1261_v11, 0.0  ;;  %v1248_v48 = vmul.f32 0.01, %v1240_v41  ;;  %v1284_v53 = vadd.f32 %v1283_v6, %v1282_v10 }
 0x7a4   :  { %v1270_v49 = vadd.f32 %v1269_v42, %v1268_v9  ;;  %v1276_v55 = vrot.slane %v1275_v46, 4  ;;  %v2961_v50 = vmax.f32 %v1242_v38, %v1250_v57  ;;  %v1225_v60 = vadd.f32 %v2252_v54, %v1224_v40 }
 0x7a5   :  { %v2964_v56 = vmax.f32 %v1240_v41, %v1248_v48  ;;  %v1251_v12 = vmul.f32 0.01, %v1243_v52  ;;  %v1291_v16 = vadd.f32 %v1290_v45, %v1289_v43  ;;  %v1285_v20 = vrot.slane %v1284_v53, 2 }
 0x7a6   :  { %v1271_v62 = vrot.slane %v1270_v49, 2  ;;  %v1277_v58 = vadd.f32 %v1276_v55, %v1275_v46  ;;  %v1266_v2 = vmul.f32 %v2961_v50, %v2747_v61  ;;  %v1241_v4 = vadd.f32 %v1225_v60, %v2765_v39 }
 0x7a7   :  { %v1264_v13 = vmul.f32 %v2964_v56, %v2727_v31  ;;  %v2972_v15 = vmax.f32 %v1243_v52, %v1251_v12  ;;  %v1292_v21 = vrot.slane %v1291_v16, 2  ;;  %v1286_v28 = vadd.f32 %v1285_v20, %v1284_v53 }
 0x7a8   :  { %v1278_v18 = vrot.slane %v1277_v58, 2  ;;  %v1310_v19 = vsel %vm279_vm2, %v1266_v2, 0.0  ;;  %v1272_v26 = vadd.f32 %v1271_v62, %v1270_v49  ;;  %v1249_v34 = vmul.f32 0.01, %v1241_v4 }
 0x7a9   :  { %v1311_v25 = vrot.slane %v1310_v19, 4  ;;  %v1296_v54 = vsel %vm279_vm2, %v1264_v13, 0.0  ;;  %v1267_v32 = vmul.f32 %v2972_v15, %v2759_v17  ;;  %v1293_v9 = vadd.f32 %v1292_v21, %v1291_v16 }
 0x7aa   :  { %v1279_v5 = vadd.f32 %v1278_v18, %v1277_v58  ;;  %v1297_v27 = vrot.slane %v1296_v54, 4  ;;  %v2978_v10 = vmax.f32 %v1241_v4, %v1249_v34  ;;  %v1273_v37 = vrot.slane %v1272_v26, 1  ;;  %v1342_v34 = vpop.permute.xlu0 %1341 }
 0x7ab   :  { %v1317_v36 = vsel %vm279_vm2, %v1267_v32, 0.0  ;;  %v1312_v33 = vadd.f32 %v1311_v25, %v1310_v19  ;;  %v1287_v42 = vrot.slane %v1286_v28, 1  ;;  %v1294_v49 = vrot.slane %v1293_v9, 1 }
 0x7ac   :  { %v1280_v24 = vrot.slane %v1279_v5, 1  ;;  %v1298_v39 = vadd.f32 %v1297_v27, %v1296_v54  ;;  %v1318_v1 = vrot.slane %v1317_v36, 4  ;;  %v1265_v6 = vmul.f32 %v2978_v10, %v2742_v51 }
 0x7ad   :  { %v1313_v43 = vrot.slane %v1312_v33, 2  ;;  %v1274_v44 = vadd.f32 %v1273_v37, %v1272_v26  ;;  %v1288_v53 = vadd.f32 %v1287_v42, %v1286_v28  ;;  %v1295_v13 = vadd.f32 %v1294_v49, %v1293_v9  ;;  %v2598_v28 = vld [vmem:[%s2829_s2 + $0x10] sm:$0xff]  }
 0x7ae   :  { %v1299_v38 = vrot.slane %v1298_v39, 2  ;;  %v1319_v40 = vadd.f32 %v1318_v1, %v1317_v36  ;;  %v1281_v11 = vadd.f32 %v1280_v24, %v1279_v5  ;;  %v1303_v57 = vsel %vm279_vm2, %v1265_v6, 0.0  ;;  %v2597_v36 = vld [vmem:[%s2823_s28 + $0x18] sm:$0xff]  }
 0x7af   :  { %v1304_v46 = vrot.slane %v1303_v57, 4  ;;  %v1314_v60 = vadd.f32 %v1313_v43, %v1312_v33  ;;  %2487 = vmatpush3.bf16.msra.mxu0 %v2597_v36  ;;  %v2266_v33 = vld [vmem:[%s2837_s6 + $0x1] ss:$0 sm:$0xff]  ;;  %v1567_v49 = vpack.c.bf16 %v2972_v15, %v2961_v50 }
 0x7b0   :  { %v1300_v41 = vadd.f32 %v1299_v38, %v1298_v39  ;;  %v1320_v45 = vrot.slane %v1319_v40, 2  ;;  %v1332_v55 = vsel %vm526_vm4, %v1281_v11, %v1274_v44  ;;  %2498 = vmatprep.subr.bf16.mxu0 %v2598_v28  ;;  %v1361_v1 = vmul.f32 %v2266_v33, %v2795_v47  ;;  %v2272_v38 = vld [vmem:[%s2842_s10 + $0x1] ss:$0 sm:$0xff]  ;;  %v2599_v44 = vld [vmem:[%s2829_s2 + $0x18] sm:$0xff]   ;;  %s2204_s2 = sld [smem:[%s3113_s0 + %s2634_s19]]  }
 0x7b1   :  { %v1305_v52 = vadd.f32 %v1304_v46, %v1303_v57  ;;  %v1333_v2 = vsel %vm528_vm5, %v1288_v53, %v1332_v55  ;;  %v1315_v16 = vrot.slane %v1314_v60, 1  ;;  %v1565_v46 = vpack.c.bf16 %v2945_v35, %v2939_v59  ;;  %v2600_v55 = vld [vmem:[%s2867_s14 + $0x8] sm:$0xff]  }
 0x7b2   :  { %v1301_v48 = vrot.slane %v1300_v41, 1  ;;  %v1321_v62 = vadd.f32 %v1320_v45, %v1319_v40  ;;  %v1334_v18 = vsel %vm530_vm6, %v1295_v13, %v1333_v2  ;;  %v1564_v45 = vpack.c.bf16 %v2949_v7, %v2941_v30 }
 0x7b3   :  { %v1306_v58 = vrot.slane %v1305_v52, 2  ;;  %v1316_v26 = vadd.f32 %v1315_v16, %v1314_v60 }
 0x7b4   :  { %v1302_v12 = vadd.f32 %v1301_v48, %v1300_v41  ;;  %v1322_v19 = vrot.slane %v1321_v62, 1  ;;  %v1566_v48 = vpack.c.bf16 %v2978_v10, %v2964_v56 }
 0x7b5   :  { %v1307_v4 = vadd.f32 %v1306_v58, %v1305_v52  ;;  %v2278_v52 = vld [vmem:[%s2873_s18 + $0x1] ss:$0 sm:$0xff] }
 0x7b6   :  { %v1335_v25 = vsel %vm532_vm7, %v1302_v12, %v1334_v18  ;;  %v1323_v5 = vadd.f32 %v1322_v19, %v1321_v62 }
 0x7b7   :  { %v1308_v20 = vrot.slane %v1307_v4, 1 }
 0x7b9   :  { %v1309_v54 = vadd.f32 %v1308_v20, %v1307_v4 }
 0x7bb   :  { %v1336_v27 = vsel %vm534_vm8, %v1309_v54, %v1335_v25 }
 0x7bc   :  { %v1337_v32 = vsel %vm536_vm9, %v1316_v26, %v1336_v27 }
 0x7bd   :  { %v1338_v21 = vsel %vm538_vm10, %v1323_v5, %v1337_v32  ;;  %v2601_v32 = vld [vmem:[%s2886_s23 + $0x10] sm:$0xff]  }
 0x7be   :  { %v1344_v24 = vsel %vm279_vm2, %v1338_v21, %v1342_v34  ;;  %v2602_v34 = vld [vmem:[%s2886_s23 + $0x18] sm:$0xff]  }
 0x7bf   :  { %v1352_v39 = vpack.c.bf16 %v1344_v24, %v1344_v24 }
 0x7c1   :  { %2481 = vmatmul.mubr.msk.bf16.vlgmr.msra.gmra.mrb[24].mxu1 %vm729_vm11, %v1352_v39 }
 0x7c2   :  { %2494 = vmatprep.mubr.msk.bf16.mxu1 %vm2616_vm3, %v2615_v0  ;;  %2493 = vmatpush3.bf16.msra.mxu1 %v2600_v55 }
 0x7c3   :  { %2510 = vmatprep.subr.bf16.mxu1 %v2601_v32 }
 0x894   :  { %v1417_v37 = vpop.f32.mrb[24].mxu1 }
 0x895   :  { %v1418_v40 = vadd.f32 %v1417_v37, %v1361_v1  ;;  %v2482_v6 = vpop.f32.mrb[25].mxu1 }
 0x896   :  { %v1420_v9 = vpop.f32.mrb[26].mxu1 }
 0x897   :  { %v1431_v11 = vadd.f32 %v2272_v38, %v1418_v40  ;;  %v2483_v41 = vpop.f32.mrb[27].mxu1 }
 0x899   :  { %v1432_v42 = vmul.f32 0.01, %v1431_v11 }
 0x89b   :  { %v1433_v43 = vmax.f32 %v1431_v11, %v1432_v42 }
 0x89d   :  { %v1439_v57 = vpack.c.bf16 %v1433_v43, %v1433_v43 }
 0x89f   :  { %2489 = vmatmul.mubr.msk.bf16.vlgmr.msra.gmra.mrb[28].mxu0 %vm279_vm2, %v1439_v57 }
 0x8a0   :  { %2499 = vmatpush3.bf16.msra.mxu0 %v2598_v28  ;;  %2502 = vmatprep.mubr.msk.bf16.mxu0 %vm279_vm2, %v1564_v45 }
 0x8a1   :  { %2500 = vmatprep.subr.bf16.mxu0 %v2599_v44 }
 0x8a4   :  { %2501 = vmatpush3.bf16.msra.mxu0 %v2599_v44  ;;  %v2297_v44 = vld [vmem:[%s2896_s29 + $0x1] ss:$0 sm:$0xff] }
 0x8a5   :  { %2522 = vmatprep.subr.bf16.mxu0 %v2615_v0 }
 0x8a7   :  { %2503 = vmatmul.mubr.msk.bf16.vlgmr.msra.gmra.mrb[32].mxu0 %vm279_vm2, %v1565_v46 }
 0x8a8   :  { %2506 = vmatprep.mubr.msk.bf16.mxu0 %vm279_vm2, %v1566_v48 }
 0x8af   :  { %2507 = vmatmul.mubr.msk.bf16.gmra.mrb[36].mxu0 %vm279_vm2, %v1567_v49 }
 0x8b0   :  { %2528 = vmatprep.mubr.msk.bf16.mxu0 %vm2616_vm3, %v2615_v0 }
 0x972   :  { %v1497_v53 = vpop.f32.mrb[28].mxu0 }
 0x973   :  { %v1498_v60 = vadd.f32 %v2278_v52, %v1497_v53  ;;  %v2490_v62 = vpop.f32.mrb[29].mxu0 }
 0x974   :  { %v1500_v58 = vpop.f32.mrb[30].mxu0 }
 0x975   :  { %v1503_v2 = vadd.f32 %v1498_v60, %v2876_v63  ;;  %v2491_v12 = vpop.f32.mrb[31].mxu0 }
 0x977   :  { %v1504_v13 = vmul.f32 0.01, %v1503_v2 }
 0x979   :  { %v1505_v4 = vmax.f32 %v1503_v2, %v1504_v13 }
 0x97a   :  { %v2504_v16 = vpop.f32.mrb[32].mxu0 }
 0x97b   :  { %1998 = vrot.lane.b32.xlu1 %v1505_v4, %s2623_s24  ;;  %v1509_v18 = vpack.c.bf16 %v1505_v4, %v1505_v4  ;;  %v1626_v19 = vpop.f32.mrb[33].mxu0  ;;  %s2211_s24 = sld [smem:[%s3113_s0 + %s2641_s3]]  }
 0x97c   :  { %v2505_v20 = vpop.f32.mrb[34].mxu0 }
 0x97d   :  { %2495 = vmatmul.mubr.msk.bf16.vlgmr.msra.gmra.mrb[28].mxu1 %vm862_vm12, %v1509_v18  ;;  %v1629_v25 = vpop.f32.mrb[35].mxu0 }
 0x97e   :  { %2511 = vmatpush3.bf16.msra.mxu1 %v2601_v32 }
 0x97f   :  { %2512 = vmatprep.subr.bf16.mxu1 %v2602_v34 }
 0x982   :  { %v2508_v54 = vpop.f32.mrb[36].mxu0  ;;  %2513 = vmatpush3.bf16.msra.mxu1 %v2602_v34 }
 0x983   :  { %v1642_v26 = vpop.f32.mrb[37].mxu0  ;;  %2532 = vmatprep.subr.bf16.mxu1 %v2615_v0 }
 0x984   :  { %v2509_v5 = vpop.f32.mrb[38].mxu0 }
 0x985   :  { %v1645_v27 = vpop.f32.mrb[39].mxu0 }
 0xa50   :  { %v1553_v63 = vpop.f32.mrb[28].mxu1 }
 0xa51   :  { %v1658_v21 = vcombine.high %v1553_v63, %v1553_v63  ;;  %v1665_v24 = vrot.slane %v1553_v63, %v2891_v22  ;;  %v2496_v39 = vpop.f32.mrb[29].mxu1 }
 0xa52   :  { %v1556_v36 = vpop.f32.mrb[30].mxu1 }
 0xa53   :  { %v1672_v28 = vrot.slane %v1658_v21, %v2891_v22  ;;  %v1673_v33 = vcombine.high %v1665_v24, %v1665_v24  ;;  %v1681_v1 = vrot.slane %v1665_v24, %v2891_v22  ;;  %v2497_v37 = vpop.f32.mrb[31].mxu1 }
 0xa55   :  { %v1674_v38 = vcombine.high %v1672_v28, %v1672_v28  ;;  %v1688_v40 = vrot.slane %v1672_v28, %v2891_v22  ;;  %v1695_v6 = vrot.slane %v1673_v33, %v2891_v22  ;;  %v1703_v9 = vcombine.high %v1681_v1, %v1681_v1 }
 0xa56   :  { %v1710_v11 = vrot.slane %v1681_v1, %v2899_v29 }
 0xa57   :  { %v1702_v41 = vrot.slane %v1674_v38, %v2891_v22  ;;  %v1704_v42 = vcombine.high %v1688_v40, %v1688_v40  ;;  %v1705_v43 = vcombine.high %v1695_v6, %v1695_v6  ;;  %v1714_v57 = vrot.slane %v1695_v6, %v2899_v29 }
 0xa58   :  { %v1718_v45 = vrot.slane %v1703_v9, %v2899_v29  ;;  %v1726_v46 = vrot.slane %v1688_v40, %v2899_v29  ;;  %v1747_v48 = vadd.f32 %v1710_v11, %v1626_v19 }
 0xa59   :  { %v1706_v49 = vcombine.high %v1702_v41, %v1702_v41  ;;  %v1722_v55 = vrot.slane %v1705_v43, %v2899_v29  ;;  %v1730_v52 = vrot.slane %v1702_v41, %v2899_v29  ;;  %v1734_v53 = vrot.slane %v1704_v42, %v2899_v29  ;;  %v2603_v43 = vld [vmem:[%s2204_s2] sm:$0xff]  }
 0xa5a   :  { %v1748_v60 = vadd.f32 %v1714_v57, %v1629_v25  ;;  %v1749_v62 = vadd.f32 %v2504_v16, %v1718_v45  ;;  %v1751_v22 = vadd.f32 %v1726_v46, %v1642_v26  ;;  %v1763_v58 = vadd.f32 %v2297_v44, %v1747_v48  ;;  %2523 = vmatpush3.bf16.msra.mxu0 %v2603_v43  ;;  %v2604_v57 = vld [vmem:[%s2204_s2 + $0x8] sm:$0xff]   ;;  %v2606_v45 = vld [vmem:[%s3053_s8] sm:$0xff]  }
 0xa5b   :  { %v1738_v2 = vrot.slane %v1706_v49, %v2899_v29  ;;  %v1750_v12 = vadd.f32 %v2505_v20, %v1722_v55  ;;  %v1752_v13 = vadd.f32 %v1730_v52, %v1645_v27  ;;  %v1753_v4 = vadd.f32 %v2508_v54, %v1734_v53  ;;  %2524 = vmatprep.subr.bf16.mxu0 %v2615_v0  ;;  %v2303_v46 = vld [vmem:[%s2932_s4 + $0x1] ss:$0 sm:$0xff] }
 0xa5c   :  { %v1765_v18 = vadd.f32 %v2297_v44, %v1749_v62  ;;  %v1764_v32 = vadd.f32 %v2297_v44, %v1748_v60  ;;  %v1771_v34 = vmul.f32 0.01, %v1763_v58  ;;  %v1767_v19 = vadd.f32 %v2297_v44, %v1751_v22 }
 0xa5d   :  { %v1766_v63 = vadd.f32 %v2297_v44, %v1750_v12  ;;  %v1768_v21 = vadd.f32 %v2297_v44, %v1752_v13  ;;  %v1754_v24 = vadd.f32 %v2509_v5, %v1738_v2  ;;  %v1769_v39 = vadd.f32 %v2297_v44, %v1753_v4 }
 0xa5e   :  { %v1773_v36 = vmul.f32 0.01, %v1765_v18  ;;  %v1772_v28 = vmul.f32 0.01, %v1764_v32  ;;  %v1775_v33 = vmul.f32 0.01, %v1767_v19  ;;  %v1779_v29 = vmax.f32 %v1763_v58, %v1771_v34  ;;  %2525 = vmatpush3.bf16.msra.mxu0 %v2604_v57 }
 0xa5f   :  { %v1774_v25 = vmul.f32 0.01, %v1766_v63  ;;  %v1776_v16 = vmul.f32 0.01, %v1768_v21  ;;  %v1770_v26 = vadd.f32 %v2297_v44, %v1754_v24  ;;  %v1777_v1 = vmul.f32 0.01, %v1769_v39  ;;  %2526 = vmatprep.subr.bf16.mxu0 %v2615_v0 }
 0xa60   :  { %v1781_v37 = vmax.f32 %v1765_v18, %v1773_v36  ;;  %v1780_v20 = vmax.f32 %v1764_v32, %v1772_v28  ;;  %v1783_v54 = vmax.f32 %v1767_v19, %v1775_v33  ;;  %v2605_v44 = vld [vmem:[%s2204_s2 + $0x10] sm:$0xff]  }
 0xa61   :  { %v1782_v27 = vmax.f32 %v1766_v63, %v1774_v25  ;;  %v1784_v38 = vmax.f32 %v1768_v21, %v1776_v16  ;;  %v1778_v40 = vmul.f32 0.01, %v1770_v26  ;;  %v1785_v41 = vmax.f32 %v1769_v39, %v1777_v1 }
 0xa62   :  { %v1792_v6 = vpack.c.bf16 %v1780_v20, %v1779_v29  ;;  %2527 = vmatpush3.bf16.msra.mxu0 %v2605_v44 }
 0xa63   :  { %v1793_v9 = vpack.c.bf16 %v1782_v27, %v1781_v37  ;;  %v1794_v11 = vpack.c.bf16 %v1784_v38, %v1783_v54  ;;  %v1786_v5 = vmax.f32 %v1770_v26, %v1778_v40 }
 0xa64   :  { %2514 = vmatprep.mubr.msk.bf16.mxu1 %vm279_vm2, %v1792_v6 }
 0xa65   :  { %2515 = vmatmul.mubr.msk.bf16.vlgmr.msra.gmra.mrb[32].mxu1 %vm279_vm2, %v1793_v9  ;;  %v1795_v42 = vpack.c.bf16 %v1786_v5, %v1785_v41 }
 0xa66   :  { %2518 = vmatprep.mubr.msk.bf16.mxu1 %vm279_vm2, %v1794_v11  ;;  %2533 = vmatpush3.bf16.msra.mxu1 %v2606_v45 }
 0xa67   :  { %2534 = vmatprep.subr.bf16.mxu1 %v2615_v0 }
 0xa6d   :  { %2519 = vmatmul.mubr.msk.bf16.gmra.mrb[36].mxu1 %vm279_vm2, %v1795_v42 }
 0xa6e   :  { %2536 = vmatprep.mubr.msk.bf16.mxu1 %vm2616_vm3, %v2615_v0 }
 0xb38   :  { %v2516_v48 = vpop.f32.mrb[32].mxu1 }
 0xb39   :  { %v1871_v49 = vadd.f32 %v2516_v48, %v2303_v46  ;;  %v1862_v55 = vpop.f32.mrb[33].mxu1 }
 0xb3a   :  { %v1863_v52 = vadd.f32 %v2303_v46, %v1862_v55  ;;  %v2517_v53 = vpop.f32.mrb[34].mxu1 }
 0xb3b   :  { %v1895_v60 = vadd.f32 %v1871_v49, %v2939_v59  ;;  %v1874_v62 = vadd.f32 %v2517_v53, %v2303_v46  ;;  %v1865_v22 = vpop.f32.mrb[35].mxu1 }
 0xb3c   :  { %v1893_v58 = vadd.f32 %v1863_v52, %v2941_v30  ;;  %v1866_v2 = vadd.f32 %v2303_v46, %v1865_v22 }
 0xb3d   :  { %v1903_v12 = vmul.f32 0.01, %v1895_v60  ;;  %v1896_v13 = vadd.f32 %v1874_v62, %v2945_v35 }
 0xb3e   :  { %v1901_v4 = vmul.f32 0.01, %v1893_v58  ;;  %v1894_v18 = vadd.f32 %v1866_v2, %v2949_v7 }
 0xb3f   :  { %v1911_v0 = vmax.f32 %v1895_v60, %v1903_v12  ;;  %v1904_v32 = vmul.f32 0.01, %v1896_v13 }
 0xb40   :  { %v1909_v34 = vmax.f32 %v1893_v58, %v1901_v4  ;;  %v1902_v19 = vmul.f32 0.01, %v1894_v18  ;;  %v2520_v63 = vpop.f32.mrb[36].mxu1 }
 0xb41   :  { %v1919_v21 = vmul.f32 %v1911_v0, %v2711_v8  ;;  %v1912_v24 = vmax.f32 %v1896_v13, %v1904_v32  ;;  %v1887_v59 = vadd.f32 %v2520_v63, %v2303_v46  ;;  %v1878_v39 = vpop.f32.mrb[37].mxu1 }
 0xb42   :  { %v1917_v36 = vmul.f32 %v1909_v34, %v2709_v3  ;;  %v1910_v30 = vmax.f32 %v1894_v18, %v1902_v19  ;;  %v1879_v28 = vadd.f32 %v2303_v46, %v1878_v39  ;;  %v2521_v33 = vpop.f32.mrb[38].mxu1 }
 0xb43   :  { %v1939_v35 = vsel %vm279_vm2, %v1919_v21, 0.0  ;;  %v1920_v25 = vmul.f32 %v1912_v24, %v2719_v23  ;;  %v1899_v7 = vadd.f32 %v1887_v59, %v2961_v50  ;;  %v1890_v16 = vadd.f32 %v2521_v33, %v2303_v46  ;;  %v1881_v26 = vpop.f32.mrb[39].mxu1 }
 0xb44   :  { %v1940_v1 = vrot.slane %v1939_v35, 4  ;;  %v1925_v37 = vsel %vm279_vm2, %v1917_v36, 0.0  ;;  %v1918_v8 = vmul.f32 %v1910_v30, %v2713_v14  ;;  %v1897_v29 = vadd.f32 %v1879_v28, %v2964_v56 }
 0xb45   :  { %v1926_v20 = vrot.slane %v1925_v37, 4  ;;  %v1946_v3 = vsel %vm279_vm2, %v1920_v25, 0.0  ;;  %v1907_v27 = vmul.f32 0.01, %v1899_v7  ;;  %v1900_v54 = vadd.f32 %v1890_v16, %v2972_v15 }
 0xb46   :  { %v1941_v38 = vadd.f32 %v1940_v1, %v1939_v35  ;;  %v1947_v40 = vrot.slane %v1946_v3, 4  ;;  %v1932_v23 = vsel %vm279_vm2, %v1918_v8, 0.0  ;;  %v1905_v50 = vmul.f32 0.01, %v1897_v29 }
 0xb47   :  { %v1927_v6 = vadd.f32 %v1926_v20, %v1925_v37  ;;  %v1933_v9 = vrot.slane %v1932_v23, 4  ;;  %v1915_v11 = vmax.f32 %v1899_v7, %v1907_v27  ;;  %v1908_v41 = vmul.f32 0.01, %v1900_v54 }
 0xb48   :  { %v1942_v5 = vrot.slane %v1941_v38, 2  ;;  %v1948_v42 = vadd.f32 %v1947_v40, %v1946_v3  ;;  %v1913_v14 = vmax.f32 %v1897_v29, %v1905_v50  ;;  %v1882_v43 = vadd.f32 %v2303_v46, %v1881_v26 }
 0xb49   :  { %v1928_v56 = vrot.slane %v1927_v6, 2  ;;  %v1934_v57 = vadd.f32 %v1933_v9, %v1932_v23  ;;  %v1923_v44 = vmul.f32 %v1915_v11, %v2747_v61  ;;  %v1916_v45 = vmax.f32 %v1900_v54, %v1908_v41  ;;  %v1999_v41 = vpop.permute.xlu1 %1998 }
 0xb4a   :  { %v1943_v48 = vadd.f32 %v1942_v5, %v1941_v38  ;;  %v1949_v15 = vrot.slane %v1948_v42, 2  ;;  %v1921_v49 = vmul.f32 %v1913_v14, %v2727_v31  ;;  %v1898_v55 = vadd.f32 %v1882_v43, %v2978_v10  ;;  %v2607_v43 = vld [vmem:[%s3053_s8 + $0x8] sm:$0xff]  }
 0xb4b   :  { %v1929_v52 = vadd.f32 %v1928_v56, %v1927_v6  ;;  %v1935_v53 = vrot.slane %v1934_v57, 2  ;;  %v1967_v60 = vsel %vm279_vm2, %v1923_v44, 0.0  ;;  %v1924_v62 = vmul.f32 %v1916_v45, %v2759_v17  ;;  %2535 = vmatpush3.bf16.msra.mxu1 %v2607_v43  ;;  %v2310_v56 = vld [vmem:[%s2205_s12] ss:$0 sm:$0xff] }
 0xb4c   :  { %v1950_v22 = vadd.f32 %v1949_v15, %v1948_v42  ;;  %v1968_v58 = vrot.slane %v1967_v60, 4  ;;  %v1953_v46 = vsel %vm279_vm2, %v1921_v49, 0.0  ;;  %v1944_v4 = vrot.slane %v1943_v48, 1  ;;  %v2315_v45 = vld [vmem:[%s2206_s16] ss:$0 sm:$0xff] }
 0xb4d   :  { %v1930_v2 = vrot.slane %v1929_v52, 1  ;;  %v1936_v12 = vadd.f32 %v1935_v53, %v1934_v57  ;;  %v1954_v61 = vrot.slane %v1953_v46, 4  ;;  %v1974_v13 = vsel %vm279_vm2, %v1924_v62, 0.0 }
 0xb4e   :  { %v1975_v18 = vrot.slane %v1974_v13, 4  ;;  %v1951_v31 = vrot.slane %v1950_v22, 1  ;;  %v1906_v32 = vmul.f32 0.01, %v1898_v55  ;;  %v1969_v34 = vadd.f32 %v1968_v58, %v1967_v60 }
 0xb4f   :  { %v1937_v0 = vrot.slane %v1936_v12, 1  ;;  %v1955_v10 = vadd.f32 %v1954_v61, %v1953_v46  ;;  %v1931_v19 = vadd.f32 %v1930_v2, %v1929_v52  ;;  %v1945_v24 = vadd.f32 %v1944_v4, %v1943_v48 }
 0xb50   :  { %v1914_v17 = vmax.f32 %v1898_v55, %v1906_v32  ;;  %v1976_v59 = vadd.f32 %v1975_v18, %v1974_v13  ;;  %v1952_v39 = vadd.f32 %v1951_v31, %v1950_v22  ;;  %v1970_v35 = vrot.slane %v1969_v34, 2  ;;  %v2320_v18 = vld [vmem:[%s2209_s1] ss:$0 sm:$0xff] }
 0xb51   :  { %v1938_v63 = vadd.f32 %v1937_v0, %v1936_v12  ;;  %v1956_v21 = vrot.slane %v1955_v10, 2  ;;  %v2016_v57 = vmul.f32 %v2310_v56, %v2795_v47  ;;  %v64_v22 = vstv %s2210_s21  ;;  %v2316_v47 = vld [vmem:[%s2208_s26] ss:$0 sm:$0xff] }
 0xb52   :  { %v1922_v28 = vmul.f32 %v1914_v17, %v2742_v51  ;;  %v1977_v26 = vrot.slane %v1976_v59, 2  ;;  %v1971_v29 = vadd.f32 %v1970_v35, %v1969_v34  ;;  %65 = vst [vmem:[#allocation2] sm:$0x1] %v64_v22 }
 0xb53   :  { %v1989_v36 = vsel %vm526_vm4, %v1938_v63, %v1931_v19  ;;  %v1957_v30 = vadd.f32 %v1956_v21, %v1955_v10 }
 0xb54   :  { %v1990_v33 = vsel %vm528_vm5, %v1945_v24, %v1989_v36  ;;  %v1960_v16 = vsel %vm279_vm2, %v1922_v28, 0.0  ;;  %v1978_v3 = vadd.f32 %v1977_v26, %v1976_v59  ;;  %v1972_v51 = vrot.slane %v1971_v29, 1 }
 0xb55   :  { %v1958_v25 = vrot.slane %v1957_v30, 1  ;;  %v1991_v7 = vsel %vm530_vm6, %v1952_v39, %v1990_v33  ;;  %v1961_v1 = vrot.slane %v1960_v16, 4 }
 0xb56   :  { %v1979_v38 = vrot.slane %v1978_v3, 1  ;;  %v1973_v50 = vadd.f32 %v1972_v51, %v1971_v29 }
 0xb57   :  { %v1959_v37 = vadd.f32 %v1958_v25, %v1957_v30  ;;  %v1962_v8 = vadd.f32 %v1961_v1, %v1960_v16 }
 0xb58   :  { %v1980_v6 = vadd.f32 %v1979_v38, %v1978_v3 }
 0xb59   :  { %v1992_v20 = vsel %vm532_vm7, %v1959_v37, %v1991_v7  ;;  %v1963_v27 = vrot.slane %v1962_v8, 2  ;;  %v2321_v32 = vld [vmem:[#allocation2] ss:$0 sm:$0xff] }
 0xb5b   :  { %v1964_v54 = vadd.f32 %v1963_v27, %v1962_v8 }
 0xb5d   :  { %v1965_v40 = vrot.slane %v1964_v54, 1 }
 0xb5f   :  { %v1966_v23 = vadd.f32 %v1965_v40, %v1964_v54 }
 0xb61   :  { %v1993_v9 = vsel %vm534_vm8, %v1966_v23, %v1992_v20 }
 0xb62   :  { %v1994_v11 = vsel %vm536_vm9, %v1973_v50, %v1993_v9 }
 0xb63   :  { %v1995_v5 = vsel %vm538_vm10, %v1980_v6, %v1994_v11 }
 0xb64   :  { %v2001_v42 = vsel %vm279_vm2, %v1995_v5, %v1999_v41 }
 0xb65   :  { %v2008_v14 = vpack.c.bf16 %v2001_v42, %v2001_v42 }
 0xb67   :  { %2529 = vmatmul.mubr.msk.bf16.vlgmr.msra.gmra.mrb[40].mxu0 %vm729_vm11, %v2008_v14 }
 0xc3a   :  { %v2072_v44 = vpop.f32.mrb[40].mxu0 }
 0xc3b   :  { %v2073_v48 = vadd.f32 %v2072_v44, %v2016_v57  ;;  %v2530_v15 = vpop.f32.mrb[41].mxu0 }
 0xc3c   :  { %v2075_v49 = vpop.f32.mrb[42].mxu0 }
 0xc3d   :  { %v2085_v55 = vadd.f32 %v2315_v45, %v2073_v48  ;;  %v2531_v52 = vpop.f32.mrb[43].mxu0 }
 0xc3f   :  { %v2086_v53 = vmul.f32 0.01, %v2085_v55 }
 0xc41   :  { %v2087_v60 = vmax.f32 %v2085_v55, %v2086_v53 }
 0xc43   :  { %v2092_v62 = vpack.c.bf16 %v2087_v60, %v2087_v60 }
 0xc45   :  { %2537 = vmatmul.mubr.msk.bf16.vlgmr.msra.gmra.mrb[40].mxu1 %vm279_vm2, %v2092_v62 }
 0xd18   :  { %v2149_v58 = vpop.f32.mrb[40].mxu1 }
 0xd19   :  { %v2150_v46 = vadd.f32 %v2316_v47, %v2149_v58  ;;  %v2538_v2 = vpop.f32.mrb[41].mxu1 }
 0xd1a   :  { %v2152_v12 = vpop.f32.mrb[42].mxu1 }
 0xd1b   :  { %v2155_v61 = vadd.f32 %v2150_v46, %v2087_v60  ;;  %v2539_v13 = vpop.f32.mrb[43].mxu1 }
 0xd1d   :  { %v2156_v4 = vmul.f32 0.01, %v2155_v61 }
 0xd1f   :  { %v2157_v31 = vmax.f32 %v2155_v61, %v2156_v4 }
 0xd21   :  { %v2165_v0 = vmul.f32 %v2320_v18, %v2157_v31 }
 0xd23   :  { %v2166_v10 = vsel %vm279_vm2, %v2165_v0, 0.0 }
 0xd24   :  { %2167 = vadd.xlane.f32.xlu0 %v2166_v10 }
 0xdb1   :  { %v2168_v34 = vpop.xlane.xlu0 %2167 }
 0xdb2   :  { %v2176_v19 = vadd.f32 %v2321_v32, %v2168_v34 }
 0xdb4   :  { %2178 = vst.msk [vmem:[%s2211_s24] sm:$0xff] %vm2177_vm13, %v2176_v19 }

</bundles_post_ra>
